<compile_context>
chip_gen: v5e
topology: v5e:2x2
jax: 0.10.0
libtpu: 0.0.40
codegen_flags: <defaults>
</compile_context>

<pallas_src>
import jax
import jax.numpy as jnp
from jax.experimental import pallas as pl
from jax.experimental.pallas import tpu as pltpu

LANE = 128  # TPU lane width; output action axis is padded up to this.


def actor_kernel(x_ref, w1_ref, b1_ref, w2_ref, b2_ref, w3_ref, b3_ref, out_ref):
    # x: (TB, S) f32; w*: bf16 (in, out); b*: (1, out) f32; out: (TB, A_pad) f32
    x = x_ref[...].astype(jnp.bfloat16)

    h1 = jnp.dot(x, w1_ref[...], preferred_element_type=jnp.float32) + b1_ref[...]
    h1 = jnp.maximum(h1, 0.0)

    h2 = jnp.dot(h1.astype(jnp.bfloat16), w2_ref[...],
                 preferred_element_type=jnp.float32) + b2_ref[...]
    h2 = jnp.maximum(h2, 0.0)

    # Padded action lanes carry a -1e30 bias -> exp(...) == 0, so they do not
    # corrupt the softmax max / denominator.
    logits = jnp.dot(h2.astype(jnp.bfloat16), w3_ref[...],
                     preferred_element_type=jnp.float32) + b3_ref[...]

    m = jnp.max(logits, axis=-1, keepdims=True)
    e = jnp.exp(logits - m)
    denom = jnp.sum(e, axis=-1, keepdims=True)
    out_ref[...] = e * pl.reciprocal(denom, approx=True)


def prepare_params(params):
    """One-time prep: cast weights to bf16, lane-pad the final layer to 128.

    Padded output columns get zero weights and a -1e30 bias so their softmax
    probability is exactly ~0 inside the kernel.
    """
    w1, b1, w2, b2, w3, b3 = params
    a = w3.shape[1]
    a_pad = ((a + LANE - 1) // LANE) * LANE
    w3p = jnp.pad(w3, ((0, 0), (0, a_pad - a)))
    b3p = jnp.pad(b3, ((0, 0), (0, a_pad - a)), constant_values=-1e30)
    return (
        w1.astype(jnp.bfloat16), b1.astype(jnp.float32),
        w2.astype(jnp.bfloat16), b2.astype(jnp.float32),
        w3p.astype(jnp.bfloat16), b3p.astype(jnp.float32),
        a,  # original action count, for slicing the lane-padded output
    )


def actor_forward(state, prepared, *, tb=256):
    """state: (B, state_size) f32 -> probs: (B, action_size) f32."""
    w1, b1, w2, b2, w3p, b3p, a = prepared
    B, S = state.shape
    a_pad = w3p.shape[1]

    # Batch tile: multiple of 8 (sublane), capped at `tb`; pad B up to it.
    tb = min(tb, max(8, ((B + 7) // 8) * 8))
    b_pad = ((B + tb - 1) // tb) * tb
    if b_pad != B:
        state = jnp.pad(state, ((0, b_pad - B), (0, 0)))

    grid = (pl.cdiv(b_pad, tb),)
    resident = lambda shape: pl.BlockSpec(shape, lambda i: (0, 0))  # weights stay in VMEM

    out = pl.pallas_call(
        actor_kernel,
        out_shape=jax.ShapeDtypeStruct((b_pad, a_pad), jnp.float32),
        grid=grid,
        in_specs=[
            pl.BlockSpec((tb, S), lambda i: (i, 0)),      # x: tiled along batch
            resident(w1.shape), resident(b1.shape),
            resident(w2.shape), resident(b2.shape),
            resident(w3p.shape), resident(b3p.shape),
        ],
        out_specs=pl.BlockSpec((tb, a_pad), lambda i: (i, 0)),  # lane-dense output
        compiler_params=pltpu.CompilerParams(
            dimension_semantics=("parallel",)),               # 2 TCs on v7x
    )(state, w1, b1, w2, b2, w3p, b3p)

    return out[:B, :a]


def init_params(key, state_size, action_size):
    """Deterministic init mimicking nn.Linear default (U(-1/sqrt(fan_in), +))."""
    def linear(key, fan_in, fan_out):
        kw, kb = jax.random.split(key)
        bound = 1.0 / jnp.sqrt(jnp.float32(fan_in))
        w = jax.random.uniform(kw, (fan_in, fan_out), jnp.float32, -bound, bound)
        b = jax.random.uniform(kb, (1, fan_out), jnp.float32, -bound, bound)
        return w, b

    k1, k2, k3 = jax.random.split(key, 3)
    w1, b1 = linear(k1, state_size, 128)
    w2, b2 = linear(k2, 128, 256)
    w3, b3 = linear(k3, 256, action_size)
    return (w1, b1, w2, b2, w3, b3)


def _reference(state, prepared):
    """Pure-JAX reference mirroring the kernel's bf16-MXU / f32-accumulate math."""
    w1, b1, w2, b2, w3p, b3p, a = prepared
    h1 = jax.nn.relu(jnp.dot(state.astype(jnp.bfloat16), w1,
                             preferred_element_type=jnp.float32) + b1)
    h2 = jax.nn.relu(jnp.dot(h1.astype(jnp.bfloat16), w2,
                             preferred_element_type=jnp.float32) + b2)
    logits = jnp.dot(h2.astype(jnp.bfloat16), w3p,
                     preferred_element_type=jnp.float32) + b3p
    return jax.nn.softmax(logits[:, :a], axis=-1)


if __name__ == "__main__":
    # CartPole-like sizes: state_size=4, action_size=2; rollout-sized batch
    # (B=500 exercises both the batch grid and the pad-to-tile path).
    B, STATE_SIZE, ACTION_SIZE = 500, 4, 2

    key = jax.random.PRNGKey(0)
    k_params, k_state = jax.random.split(key)

    params = init_params(k_params, STATE_SIZE, ACTION_SIZE)
    prepared = prepare_params(params)
    state = jax.random.normal(k_state, (B, STATE_SIZE), jnp.float32)

    probs = actor_forward(state, prepared)
    probs = jax.block_until_ready(probs)

    # Sanity check vs. a pure-JAX reference of the same (bf16-weight) forward.
    ref = _reference(state, prepared)
    assert probs.shape == (B, ACTION_SIZE), "bad output shape"
    assert jnp.allclose(probs, ref, atol=2e-3, rtol=2e-3), "mismatch vs reference"
    # approx reciprocal => probs sum to 1 only to ~1e-3
    assert jnp.allclose(jnp.sum(probs, axis=-1), 1.0, atol=2e-3), "probs don't sum to 1"

    # TODO(synk): torch.distributions.Categorical sampling stays outside the
    # kernel; it consumes these probabilities host/JAX-side.
    print("KERNEL_OK")
</pallas_src>

<mosaic_0001>
module attributes {stable_mosaic.version = 11 : i64} {
  func.func @actor_kernel(%arg0: i32, %arg1: memref<256x4xf32, #tpu.memory_space<vmem>>, %arg2: memref<4x128xbf16, #tpu.memory_space<vmem>>, %arg3: memref<1x128xf32, #tpu.memory_space<vmem>>, %arg4: memref<128x256xbf16, #tpu.memory_space<vmem>>, %arg5: memref<1x256xf32, #tpu.memory_space<vmem>>, %arg6: memref<256x128xbf16, #tpu.memory_space<vmem>>, %arg7: memref<1x128xf32, #tpu.memory_space<vmem>>, %arg8: memref<256x128xf32, #tpu.memory_space<vmem>>) attributes {dimension_semantics = [#tpu.dimension_semantics<parallel>], iteration_bounds = array<i64: 2>, scalar_prefetch = 0 : i64, scratch_operands = 0 : i64, tpu.core_type = #tpu.core_type<tc>, window_params = [{transform_indices = @transform_0, window_bounds = array<i64: 256, 4>}, {pipeline_mode = #tpu.pipeline_mode<synchronous>, transform_indices = @transform_1, window_bounds = array<i64: 4, 128>}, {pipeline_mode = #tpu.pipeline_mode<synchronous>, transform_indices = @transform_2, window_bounds = array<i64: 1, 128>}, {pipeline_mode = #tpu.pipeline_mode<synchronous>, transform_indices = @transform_3, window_bounds = array<i64: 128, 256>}, {pipeline_mode = #tpu.pipeline_mode<synchronous>, transform_indices = @transform_4, window_bounds = array<i64: 1, 256>}, {pipeline_mode = #tpu.pipeline_mode<synchronous>, transform_indices = @transform_5, window_bounds = array<i64: 256, 128>}, {pipeline_mode = #tpu.pipeline_mode<synchronous>, transform_indices = @transform_6, window_bounds = array<i64: 1, 128>}, {transform_indices = @transform_7, window_bounds = array<i64: 256, 128>}]} {
    %c0 = arith.constant 0 : index
    %c0_0 = arith.constant 0 : index
    %0 = vector.load %arg1[%c0, %c0_0] : memref<256x4xf32, #tpu.memory_space<vmem>>, vector<256x4xf32>
    %1 = arith.truncf %0 : vector<256x4xf32> to vector<256x4xbf16>
    %c0_1 = arith.constant 0 : index
    %c0_2 = arith.constant 0 : index
    %2 = vector.load %arg2[%c0_1, %c0_2] : memref<4x128xbf16, #tpu.memory_space<vmem>>, vector<4x128xbf16>
    %cst = arith.constant dense<0.000000e+00> : vector<256x128xf32>
    %3 = tpu.matmul %1, %2, %cst {dimension_numbers = #tpu.dot_dimension_numbers<[1], [0], [0], [1], [0, 0, 1, 1], [], []>} : vector<256x4xbf16>, vector<4x128xbf16>, vector<256x128xf32> -> vector<256x128xf32>
    %c0_3 = arith.constant 0 : index
    %c0_4 = arith.constant 0 : index
    %4 = vector.load %arg3[%c0_3, %c0_4] : memref<1x128xf32, #tpu.memory_space<vmem>>, vector<1x128xf32>
    %5 = vector.broadcast %4 : vector<1x128xf32> to vector<256x128xf32>
    %6 = arith.addf %3, %5 : vector<256x128xf32>
    %cst_5 = arith.constant 0.000000e+00 : f32
    %7 = vector.broadcast %cst_5 : f32 to vector<256x128xf32>
    %8 = arith.maximumf %6, %7 : vector<256x128xf32>
    %9 = arith.truncf %8 : vector<256x128xf32> to vector<256x128xbf16>
    %c0_6 = arith.constant 0 : index
    %c0_7 = arith.constant 0 : index
    %10 = vector.load %arg4[%c0_6, %c0_7] : memref<128x256xbf16, #tpu.memory_space<vmem>>, vector<128x256xbf16>
    %cst_8 = arith.constant dense<0.000000e+00> : vector<256x256xf32>
    %11 = tpu.matmul %9, %10, %cst_8 {dimension_numbers = #tpu.dot_dimension_numbers<[1], [0], [0], [1], [0, 0, 1, 1], [], []>} : vector<256x128xbf16>, vector<128x256xbf16>, vector<256x256xf32> -> vector<256x256xf32>
    %c0_9 = arith.constant 0 : index
    %c0_10 = arith.constant 0 : index
    %12 = vector.load %arg5[%c0_9, %c0_10] : memref<1x256xf32, #tpu.memory_space<vmem>>, vector<1x256xf32>
    %13 = vector.broadcast %12 : vector<1x256xf32> to vector<256x256xf32>
    %14 = arith.addf %11, %13 : vector<256x256xf32>
    %cst_11 = arith.constant 0.000000e+00 : f32
    %15 = vector.broadcast %cst_11 : f32 to vector<256x256xf32>
    %16 = arith.maximumf %14, %15 : vector<256x256xf32>
    %17 = arith.truncf %16 : vector<256x256xf32> to vector<256x256xbf16>
    %c0_12 = arith.constant 0 : index
    %c0_13 = arith.constant 0 : index
    %18 = vector.load %arg6[%c0_12, %c0_13] : memref<256x128xbf16, #tpu.memory_space<vmem>>, vector<256x128xbf16>
    %cst_14 = arith.constant dense<0.000000e+00> : vector<256x128xf32>
    %19 = tpu.matmul %17, %18, %cst_14 {dimension_numbers = #tpu.dot_dimension_numbers<[1], [0], [0], [1], [0, 0, 1, 1], [], []>} : vector<256x256xbf16>, vector<256x128xbf16>, vector<256x128xf32> -> vector<256x128xf32>
    %c0_15 = arith.constant 0 : index
    %c0_16 = arith.constant 0 : index
    %20 = vector.load %arg7[%c0_15, %c0_16] : memref<1x128xf32, #tpu.memory_space<vmem>>, vector<1x128xf32>
    %21 = vector.broadcast %20 : vector<1x128xf32> to vector<256x128xf32>
    %22 = arith.addf %19, %21 : vector<256x128xf32>
    %cst_17 = arith.constant dense<0xFF800000> : vector<256xf32>
    %23 = vector.multi_reduction <maximumf>, %22, %cst_17 [1] : vector<256x128xf32> to vector<256xf32>
    %24 = vector.shape_cast %23 : vector<256xf32> to vector<256x1xf32>
    %25 = vector.broadcast %24 : vector<256x1xf32> to vector<256x128xf32>
    %26 = arith.subf %22, %25 : vector<256x128xf32>
    %27 = math.exp %26 : vector<256x128xf32>
    %cst_18 = arith.constant dense<0.000000e+00> : vector<256xf32>
    %28 = vector.multi_reduction <add>, %27, %cst_18 [1] : vector<256x128xf32> to vector<256xf32>
    %29 = vector.shape_cast %28 : vector<256xf32> to vector<256x1xf32>
    %30 = tpu.reciprocal %29 {approx = true} : vector<256x1xf32> -> vector<256x1xf32>
    %31 = vector.broadcast %30 : vector<256x1xf32> to vector<256x128xf32>
    %32 = arith.mulf %27, %31 : vector<256x128xf32>
    %c0_19 = arith.constant 0 : index
    %c0_20 = arith.constant 0 : index
    %33 = vector.load %arg8[%c0_19, %c0_20] : memref<256x128xf32, #tpu.memory_space<vmem>>, vector<256x128xf32>
    tpu.vector_store %arg8[%c0_19, %c0_20], %32 {strides = array<i32>} : memref<256x128xf32, #tpu.memory_space<vmem>>, vector<256x128xf32>,
    return
  }
  func.func @transform_0(%arg0: i32) -> (i32, i32) {
    %c0_i32 = arith.constant 0 : i32
    %c0_i32_0 = arith.constant 0 : i32
    return %arg0, %c0_i32 : i32, i32
  }
  func.func @transform_1(%arg0: i32) -> (i32, i32) {
    %c0_i32 = arith.constant 0 : i32
    %c0_i32_0 = arith.constant 0 : i32
    %c0_i32_1 = arith.constant 0 : i32
    return %c0_i32, %c0_i32_0 : i32, i32
  }
  func.func @transform_2(%arg0: i32) -> (i32, i32) {
    %c0_i32 = arith.constant 0 : i32
    %c0_i32_0 = arith.constant 0 : i32
    %c0_i32_1 = arith.constant 0 : i32
    return %c0_i32, %c0_i32_0 : i32, i32
  }
  func.func @transform_3(%arg0: i32) -> (i32, i32) {
    %c0_i32 = arith.constant 0 : i32
    %c0_i32_0 = arith.constant 0 : i32
    %c0_i32_1 = arith.constant 0 : i32
    return %c0_i32, %c0_i32_0 : i32, i32
  }
  func.func @transform_4(%arg0: i32) -> (i32, i32) {
    %c0_i32 = arith.constant 0 : i32
    %c0_i32_0 = arith.constant 0 : i32
    %c0_i32_1 = arith.constant 0 : i32
    return %c0_i32, %c0_i32_0 : i32, i32
  }
  func.func @transform_5(%arg0: i32) -> (i32, i32) {
    %c0_i32 = arith.constant 0 : i32
    %c0_i32_0 = arith.constant 0 : i32
    %c0_i32_1 = arith.constant 0 : i32
    return %c0_i32, %c0_i32_0 : i32, i32
  }
  func.func @transform_6(%arg0: i32) -> (i32, i32) {
    %c0_i32 = arith.constant 0 : i32
    %c0_i32_0 = arith.constant 0 : i32
    %c0_i32_1 = arith.constant 0 : i32
    return %c0_i32, %c0_i32_0 : i32, i32
  }
  func.func @transform_7(%arg0: i32) -> (i32, i32) {
    %c0_i32 = arith.constant 0 : i32
    %c0_i32_0 = arith.constant 0 : i32
    return %arg0, %c0_i32 : i32, i32
  }
}

</mosaic_0001>

<bundles_post_ra>
// kernel: tpu_custom_call.1
= control target key start
LH: loop header
LB: loop body
LE: loop exit
PB: predicated region body
PF: predicated region fallthrough
CT: control target
= control target key end

     0   :  { %12 = vsyncpa [#allocation3], 0  ;;  %s2812_s0 = inlined_call_operand.vmem [shape: f32[512,4], index: 0, kind: input, shape index: {}]   ;;  %s2813_s1 = inlined_call_operand.vmem [shape: bf16[4,128], index: 1, kind: input, shape index: {}]   ;;  %s2814_s2 = inlined_call_operand.vmem [shape: f32[1,128], index: 2, kind: input, shape index: {}]   ;;  %s2815_s3 = inlined_call_operand.vmem [shape: bf16[128,256], index: 3, kind: input, shape index: {}]   ;;  %s2816_s4 = inlined_call_operand.vmem [shape: f32[1,256], index: 4, kind: input, shape index: {}]   ;;  %s2817_s5 = inlined_call_operand.vmem [shape: bf16[256,128], index: 5, kind: input, shape index: {}]   ;;  %s2818_s6 = inlined_call_operand.vmem [shape: f32[1,128], index: 6, kind: input, shape index: {}]   ;;  %s2819_s7 = inlined_call_operand.hbm [shape: f32[512,128], index: 7, kind: output, shape index: {}]  }
   0x1   :  { %14 = vsyncpa [#allocation3 + $0x1], 0  ;;  %s2085_s24 = smov 0   ;;  %s2087_s25 = smov 0  }
   0x2   :  { %s2089_s26 = smov 0   ;;  %s2091_s27 = smov 0  }
   0x3 LB: > { %s2106_s28 = sadd.s32 4294967295, %s2041_s27   ;;  %s1608_s29 = sadd.s32 4294967294, %s2041_s27   ;;  %s2041_s27 = sphi %s2091_s27, %s2825_s27   ;;  %s2037_s26 = sphi %s2089_s26, %s2824_s26   ;;  %s2033_s25 = sphi %s2087_s25, %s2823_s25   ;;  %s2029_s24 = sphi %s2085_s24, %s2822_s24  }
   0x4   : > { %s2110_s30 = sadd.s32 1, %s2041_s27   ;;  %s179_s8 = sadd.s32 1, %s2037_s26 }
   0x5   : > { %s176_s9 = ssub.s32 %s2041_s27, %s2110_s30  ;;  %p189_p0 = scmp.ne.s32.totalorder %s2037_s26, %s2033_s25 }
   0x6   : > { %p177_p1 = scmp.eq.s32.totalorder %s176_s9, 0  ;;  %p190_p2 = scmp.eq.s32.totalorder %s2106_s28, 1 }
   0x7   : > { %p195_p3 = scmp.ne.s32.totalorder %s2033_s25, %s2029_s24  ;;  %p196_p4 = scmp.eq.s32.totalorder %s1608_s29, 1 }
   0x8   : > { %s2121_s10 = scalar_select %p177_p1, %s2037_s26, %s179_s8  }
   0x9   : > { %p2123_p5 = por %p190_p2, %p189_p0  ;;  %p2127_p6 = por %p196_p4, %p195_p3 }
   0xa   : > { %p1611_p7 = scmp.ge.s32.totalorder %s2041_s27, 1  ;;  %p241_p8 = scmp.lt.s32.totalorder %s2041_s27, 3 }
   0xc   : > { %p242_p9 = pnand %p1611_p7, %p241_p8 }
   0xd   : > { %s1613_s15 = sshll.u32 (!%p242_p9), %s2106_s28, 5  ;;  %s270_s14 = sand.u32 (!%p242_p9), 1, %s2033_s25  }
   0xe   : > { %245 = sbr.rel (%p242_p9) target bundleno = 949 (0x3b5), region = 48  ;;  %p274_p10 = scmp.lt.s32.totalorder (!%p242_p9), %s1613_s15, 63 }
   0xf   : > { %s1796_s17 = sshll.u32 (!%p242_p9), %s2106_s28, 8  ;;  %s1531_s28 = scalar_lea.sflag (!%p242_p9), [#allocation3], %s270_s14 }
  0x10   : > { %s1542_s21 = scalar_lea.hbm (!%p242_p9), %s2819_s7, %s1796_s17  ;;  %s1999_s13 = scalar_lea.hbm (!%p242_p9), %s2819_s7, 512 }
  0x11   : > { %s1545_s23 = sshll.u32 (!%p242_p9), %s1542_s21, 4  ;;  %s1546_s23 = int_to_ptr.hbm [resolvable:$true] %s1545_s23 }
  0x12   : > { %s1993_s29 = sshra.s32 (!%p242_p9), %s1546_s23, 4  ;;  %s1994_s29 = int_to_ptr.hbm [resolvable:$true] %s1993_s29 }
  0x13   : > { %v329_v0 = vld [vmem:[%s2813_s1] sm:$0x3]  ;;  %vm383_vm0 = vcmask 1041408   ;;  %s2827_s15 = smov (!%p274_p10, %s1613_s15), 63  ;;  %vm334_vm1 = vcmask 31744   ;;  %s1995_s8 = scalar_lea.hbm %s1994_s29, 256 }
  0x14   : > { %v385_v1 = vsel %vm383_vm0, %v329_v0, 0  ;;  %s1614_s16 = sshll.u32 %s2827_s15, 3  ;;  %v1689_v14 = vld [vmem:[%s2815_s3 + $0x70] sm:$0xf]  ;;  %v1779_v15 = vld [vmem:[%s2815_s3 + $0x74] sm:$0xf0]  ;;  %p1996_p11 = scmp.ne.s32.totalorder %s1994_s29, %s1995_s8 }
  0x15   : > { %394 = vmatpush.bf16.msra.mxu0 %v385_v1  ;;  %1797 = vmatpush.bf16.msra.mxu1 %v385_v1  ;;  %s2140_s19 = scalar_lea.vmem %s2812_s0, %s1614_s16  ;;  %v1690_v17 = vor.u32 %v1779_v15, %v1689_v14  ;;  %v1681_v19 = vld [vmem:[%s2815_s3 + $0x60] sm:$0xf]  ;;  %v1777_v20 = vld [vmem:[%s2815_s3 + $0x64] sm:$0xf0]  ;;  %v1673_v23 = vld [vmem:[%s2815_s3 + $0x50] sm:$0xf]  ;;  %p2000_p0 = scmp.lt.s32.totalorder %s1994_s29, %s2819_s7 }
  0x16   : > { %1798 = vmatpush.bf16.msra.mxu2 %v385_v1  ;;  %1799 = vmatpush.bf16.msra.mxu3 %v385_v1  ;;  %v281_v2 = vld [vmem:[%s2140_s19] sm:$0xff]  ;;  %v282_v3 = vld [vmem:[%s2140_s19 + $0x8] sm:$0xff]  ;;  %v283_v5 = vld [vmem:[%s2140_s19 + $0x10] sm:$0xff]  ;;  %v1682_v22 = vor.u32 %v1777_v20, %v1681_v19  ;;  %s1612_s15 = sshll.u32 %s270_s14, 8  ;;  %p1997_p12 = pnand %p1996_p11, %p2123_p5 }
  0x17   : > { %v313_v4 = vpack.c.bf16 %v282_v3, %v281_v2  ;;  %v284_v6 = vld [vmem:[%s2140_s19 + $0x18] sm:$0xff]  ;;  %v291_v8 = vld [vmem:[%s2140_s19 + $0x50] sm:$0xff]  ;;  %v285_v11 = vld [vmem:[%s2140_s19 + $0x20] sm:$0xff]  ;;  %s2644_s16 = scalar_lea.vmem [#allocation2], %s1612_s15  ;;  %p2001_p1 = scmp.lt.s32.totalorder %s1999_s13, %s1995_s8 }
  0x18   : > { %v314_v7 = vpack.c.bf16 %v284_v6, %v283_v5  ;;  %v292_v9 = vld [vmem:[%s2140_s19 + $0x58] sm:$0xff]  ;;  %v286_v12 = vld [vmem:[%s2140_s19 + $0x28] sm:$0xff]  ;;  %v293_v16 = vld [vmem:[%s2140_s19 + $0x60] sm:$0xff]  ;;  %s1543_s22 = sshll.u32 %s2644_s16, 4  ;;  %p1998_p13 = pneg %p1997_p12  ;;  %s1544_s22 = int_to_ptr.vmem [resolvable:$true] %s1543_s22 }
  0x19   : > { %1615 = vmatmul.msk.bf16.vlgmr.msra.gmra.mxu0 %vm334_vm1, %v313_v4  ;;  %v318_v10 = vpack.c.bf16 %v292_v9, %v291_v8  ;;  %v315_v13 = vpack.c.bf16 %v286_v12, %v285_v11  ;;  %v294_v18 = vld [vmem:[%s2140_s19 + $0x68] sm:$0xff]  ;;  %626 = vmatpush.bf16.msrb.mxu1 %v1690_v17  ;;  %v1775_v24 = vld [vmem:[%s2815_s3 + $0x54] sm:$0xf0]  ;;  %v301_v25 = vld [vmem:[%s2140_s19 + $0xa0] sm:$0xff]  ;;  %p2002_p2 = por %p2001_p1, %p2000_p0 }
  0x1a   : > { %v319_v21 = vpack.c.bf16 %v294_v18, %v293_v16  ;;  %v302_v26 = vld [vmem:[%s2140_s19 + $0xa8] sm:$0xff]  ;;  %v1778_v28 = vld [vmem:[%s2815_s3 + $0x74] sm:$0xf]  ;;  %v1691_v29 = vld [vmem:[%s2815_s3 + $0x78] sm:$0xf0]  ;;  %v1674_v31 = vor.u32 %v1775_v24, %v1673_v23 }
  0x1b   : > { %1620 = vmatmul.msk.bf16.vlgmr.msra.gmra.mxu1 %vm334_vm1, %v318_v10  ;;  %v323_v27 = vpack.c.bf16 %v302_v26, %v301_v25  ;;  %v1776_v30 = vld [vmem:[%s2815_s3 + $0x64] sm:$0xf]  ;;  %v1694_v32 = vor.u32 %v1778_v28, %v1691_v29  ;;  %v1683_v33 = vld [vmem:[%s2815_s3 + $0x68] sm:$0xf0]  ;;  %v1665_v34 = vld [vmem:[%s2815_s3 + $0x40] sm:$0xf]  ;;  %p2003_p3 = pnand %p2002_p2, %p1998_p13 }
  0x1c   : > { %v1773_v35 = vld [vmem:[%s2815_s3 + $0x44] sm:$0xf0]  ;;  %v287_v36 = vld [vmem:[%s2140_s19 + $0x30] sm:$0xff]  ;;  %v288_v37 = vld [vmem:[%s2140_s19 + $0x38] sm:$0xff]  ;;  %v1686_v38 = vor.u32 %v1776_v30, %v1683_v33 }
  0x1d   : > { %627 = vmatpush.bf16.msrb.mxu1 %v1682_v22  ;;  %1625 = vmatmul.msk.bf16.vlgmr.msra.gmra.mxu2 %vm334_vm1, %v323_v27  ;;  %v1774_v39 = vld [vmem:[%s2815_s3 + $0x54] sm:$0xf]  ;;  %v1675_v40 = vld [vmem:[%s2815_s3 + $0x58] sm:$0xf0]  ;;  %v1666_v41 = vor.u32 %v1773_v35, %v1665_v34  ;;  %v316_v42 = vpack.c.bf16 %v288_v37, %v287_v36  ;;  %v1657_v43 = vld [vmem:[%s2815_s3 + $0x30] sm:$0xf] }
  0x1e   : > { %715 = vmatpush.bf16.msrb.mxu2 %v1694_v32  ;;  %v1771_v44 = vld [vmem:[%s2815_s3 + $0x34] sm:$0xf0]  ;;  %v295_v45 = vld [vmem:[%s2140_s19 + $0x70] sm:$0xff]  ;;  %v1678_v47 = vor.u32 %v1774_v39, %v1675_v40  ;;  %v1649_v49 = vld [vmem:[%s2815_s3 + $0x20] sm:$0xf] }
  0x1f   : > { %v296_v46 = vld [vmem:[%s2140_s19 + $0x78] sm:$0xff]  ;;  %v1658_v48 = vor.u32 %v1771_v44, %v1657_v43  ;;  %v1769_v51 = vld [vmem:[%s2815_s3 + $0x24] sm:$0xf0]  ;;  %v303_v52 = vld [vmem:[%s2140_s19 + $0xb0] sm:$0xff] }
  0x20   : > { %v320_v50 = vpack.c.bf16 %v296_v46, %v295_v45  ;;  %v304_v53 = vld [vmem:[%s2140_s19 + $0xb8] sm:$0xff]  ;;  %v1650_v54 = vor.u32 %v1769_v51, %v1649_v49  ;;  %v1772_v56 = vld [vmem:[%s2815_s3 + $0x44] sm:$0xf]  ;;  %v1667_v57 = vld [vmem:[%s2815_s3 + $0x48] sm:$0xf0] }
  0x21   : > { %628 = vmatpush.bf16.msrb.mxu1 %v1674_v31  ;;  %v324_v55 = vpack.c.bf16 %v304_v53, %v303_v52  ;;  %v1641_v58 = vld [vmem:[%s2815_s3 + $0x10] sm:$0xf]  ;;  %v1670_v59 = vor.u32 %v1772_v56, %v1667_v57  ;;  %v1767_v60 = vld [vmem:[%s2815_s3 + $0x14] sm:$0xf0]  ;;  %v1770_v61 = vld [vmem:[%s2815_s3 + $0x34] sm:$0xf] }
  0x22   : > { %716 = vmatpush.bf16.msrb.mxu2 %v1686_v38  ;;  %v1659_v62 = vld [vmem:[%s2815_s3 + $0x38] sm:$0xf0]  ;;  %v1642_v63 = vor.u32 %v1767_v60, %v1641_v58  ;;  %v289_v1 = vld [vmem:[%s2140_s19 + $0x40] sm:$0xff]  ;;  %v290_v2 = vld [vmem:[%s2140_s19 + $0x48] sm:$0xff] }
  0x23   : > { %v1662_v0 = vor.u32 %v1770_v61, %v1659_v62  ;;  %v317_v3 = vpack.c.bf16 %v290_v2, %v289_v1  ;;  %v297_v4 = vld [vmem:[%s2140_s19 + $0x80] sm:$0xff]  ;;  %v298_v5 = vld [vmem:[%s2140_s19 + $0x88] sm:$0xff]  ;;  %v300_v8 = vld [vmem:[%s2140_s19 + $0x98] sm:$0xff] }
  0x24   : > { %v321_v6 = vpack.c.bf16 %v298_v5, %v297_v4  ;;  %v1768_v10 = vld [vmem:[%s2815_s3 + $0x24] sm:$0xf]  ;;  %v1651_v11 = vld [vmem:[%s2815_s3 + $0x28] sm:$0xf0]  ;;  %v1643_v14 = vld [vmem:[%s2815_s3 + $0x18] sm:$0xf0] }
  0x25   : > { %629 = vmatpush.bf16.msrb.mxu1 %v1666_v41  ;;  %v1654_v12 = vor.u32 %v1768_v10, %v1651_v11  ;;  %v1633_v16 = vld [vmem:[%s2815_s3] sm:$0xf]  ;;  %v1765_v17 = vld [vmem:[%s2815_s3 + $0x4] sm:$0xf0]  ;;  %v1764_v18 = vld [vmem:[%s2815_s3 + $0x4] sm:$0xf] }
  0x26   : > { %717 = vmatpush.bf16.msrb.mxu2 %v1678_v47  ;;  %v1634_v19 = vor.u32 %v1765_v17, %v1633_v16  ;;  %v1635_v20 = vld [vmem:[%s2815_s3 + $0x8] sm:$0xf0]  ;;  %v2277_v23 = vld [vmem:[%s2814_s2] ss:$0 sm:$0xff]  ;;  %v307_v41 = vld [vmem:[%s2140_s19 + $0xd0] sm:$0xff] }
  0x27   : > { %v305_v31 = vld [vmem:[%s2140_s19 + $0xc0] sm:$0xff]  ;;  %v306_v32 = vld [vmem:[%s2140_s19 + $0xc8] sm:$0xff]  ;;  %v312_v1 = vld [vmem:[%s2140_s19 + $0xf8] sm:$0xff] }
  0x28   : > { %v325_v33 = vpack.c.bf16 %v306_v32, %v305_v31  ;;  %v309_v51 = vld [vmem:[%s2140_s19 + $0xe0] sm:$0xff]  ;;  %v310_v52 = vld [vmem:[%s2140_s19 + $0xe8] sm:$0xff]  ;;  %v1786_v5 = vld [vmem:[%s2817_s5 + $0x30] sm:$0xff] }
  0x29   : > { %1616 = vmatmul.msk.bf16.gmra.mxu0 %vm334_vm1, %v314_v7  ;;  %630 = vmatpush.bf16.msrb.mxu1 %v1658_v48  ;;  %v299_v7 = vld [vmem:[%s2140_s19 + $0x90] sm:$0xff]  ;;  %v1793_v16 = vld [vmem:[%s2817_s5 + $0x68] sm:$0xff] }
  0x2a   : > { %718 = vmatpush.bf16.msrb.mxu2 %v1670_v59  ;;  %v322_v9 = vpack.c.bf16 %v300_v8, %v299_v7  ;;  %1627 = vmatmul.msk.bf16.vlgmr.msra.gmra.mxu3 %vm334_vm1, %v325_v33 }
  0x2b   : > { %1621 = vmatmul.msk.bf16.gmra.mxu1 %vm334_vm1, %v319_v21  ;;  %v1638_v21 = vor.u32 %v1764_v18, %v1635_v20 }
  0x2d   : > { %631 = vmatpush.bf16.msrb.mxu1 %v1650_v54  ;;  %1626 = vmatmul.msk.bf16.gmra.mxu2 %vm334_vm1, %v324_v55  ;;  %v327_v54 = vpack.c.bf16 %v310_v52, %v309_v51 }
  0x2e   : > { %719 = vmatpush.bf16.msrb.mxu2 %v1662_v0  ;;  %v311_v0 = vld [vmem:[%s2140_s19 + $0xf0] sm:$0xff] }
  0x2f   : > { %v328_v4 = vpack.c.bf16 %v312_v1, %v311_v0 }
  0x31   : > { %632 = vmatpush.bf16.msrb.mxu1 %v1642_v63  ;;  %v1787_v63 = vld [vmem:[%s2817_s5 + $0x38] sm:$0xff] }
  0x32   : > { %720 = vmatpush.bf16.msrb.mxu2 %v1654_v12  ;;  %1032 = vmatpush.bf16.msrb.mxu3 %v1787_v63 }
  0x35   : > { %633 = vmatpush.bf16.msrb.mxu1 %v1634_v19 }
  0x36   : > { %1033 = vmatpush.bf16.msrb.mxu3 %v1786_v5 }
  0x39   : > { %1617 = vmatmul.msk.bf16.gmra.mxu0 %vm334_vm1, %v315_v13  ;;  %v1766_v13 = vld [vmem:[%s2815_s3 + $0x14] sm:$0xf] }
  0x3a   : > { %v1646_v15 = vor.u32 %v1766_v13, %v1643_v14  ;;  %v1785_v13 = vld [vmem:[%s2817_s5 + $0x28] sm:$0xff]  ;;  %v1794_v14 = vld [vmem:[%s2817_s5 + $0x70] sm:$0xff] }
  0x3b   : > { %1622 = vmatmul.msk.bf16.gmra.mxu1 %vm334_vm1, %v320_v50  ;;  %1034 = vmatpush.bf16.msrb.mxu3 %v1785_v13 }
  0x3c   : > { %721 = vmatpush.bf16.msrb.mxu2 %v1646_v15  ;;  %v1784_v15 = vld [vmem:[%s2817_s5 + $0x20] sm:$0xff] }
  0x3f   : > { %1035 = vmatpush.bf16.msrb.mxu3 %v1784_v15 }
  0x40   : > { %722 = vmatpush.bf16.msrb.mxu2 %v1638_v21 }
  0x49   : > { %1618 = vmatmul.msk.bf16.gmra.mxu0 %vm334_vm1, %v316_v42  ;;  %v308_v42 = vld [vmem:[%s2140_s19 + $0xd8] sm:$0xff] }
  0x4a   : > { %v326_v43 = vpack.c.bf16 %v308_v42, %v307_v41  ;;  %v1780_v42 = vld [vmem:[%s2817_s5] sm:$0xff] }
  0x4b   : > { %1623 = vmatmul.msk.bf16.gmra.mxu1 %vm334_vm1, %v321_v6 }
  0x4c   : > { %1628 = vmatmul.msk.bf16.gmra.mxu3 %vm334_vm1, %v326_v43  ;;  %v1789_v43 = vld [vmem:[%s2817_s5 + $0x48] sm:$0xff] }
  0x59   : > { %1619 = vmatmul.msk.bf16.gmra.mxu0 %vm334_vm1, %v317_v3  ;;  %v1795_v3 = vld [vmem:[%s2817_s5 + $0x78] sm:$0xff] }
  0x5a   : > { %1121 = vmatpush.bf16.msrb.mxu0 %v1795_v3  ;;  %1800 = vmatpush.bf16.msra.mxu2 %v1795_v3 }
  0x5b   : > { %1624 = vmatmul.msk.bf16.gmra.mxu1 %vm334_vm1, %v322_v9 }
  0x5c   : > { %1629 = vmatmul.msk.bf16.gmra.mxu3 %vm334_vm1, %v327_v54 }
  0x5e   : > { %1122 = vmatpush.bf16.msrb.mxu0 %v1794_v14  ;;  %1801 = vmatpush.bf16.msra.mxu2 %v1794_v14 }
  0x62   : > { %1123 = vmatpush.bf16.msrb.mxu0 %v1793_v16  ;;  %1802 = vmatpush.bf16.msra.mxu2 %v1793_v16 }
  0x6c   : > { %1630 = vmatmul.msk.bf16.gmra.mxu3 %vm334_vm1, %v328_v4 }
  0x96   : > { %v396_v22 = vpop.f32.mrf.mxu0 }
  0x97   : > { %v397_v24 = vadd.f32 %v2277_v23, %v396_v22 }
  0x98   : > { %v421_v47 = vpop.f32.mrf.mxu1 }
  0x99   : > { %v476_v27 = vmax.f32 %v397_v24, 0.0  ;;  %v422_v18 = vadd.f32 %v2277_v23, %v421_v47  ;;  %v1788_v47 = vld [vmem:[%s2817_s5 + $0x40] sm:$0xff] }
  0x9b   : > { %v486_v20 = vmax.f32 %v422_v18, 0.0 }
  0x9e   : > { %v398_v25 = vpop.f32.mrf.mxu0 }
  0x9f   : > { %v399_v26 = vadd.f32 %v2277_v23, %v398_v25  ;;  %v1783_v25 = vld [vmem:[%s2817_s5 + $0x18] sm:$0xff] }
  0xa0   : > { %v423_v55 = vpop.f32.mrf.mxu1  ;;  %1036 = vmatpush.bf16.msrb.mxu3 %v1783_v25  ;;  %v2335_v33 = vpop.f32.mrf.mxu2 }
  0xa1   : > { %v477_v28 = vmax.f32 %v399_v26, 0.0  ;;  %v424_v19 = vadd.f32 %v2277_v23, %v423_v55  ;;  %v1792_v26 = vld [vmem:[%s2817_s5 + $0x60] sm:$0xff] }
  0xa2   : > { %1124 = vmatpush.bf16.msrb.mxu0 %v1792_v26  ;;  %1803 = vmatpush.bf16.msra.mxu2 %v1792_v26 }
  0xa3   : > { %v508_v29 = vpack.c.bf16 %v477_v28, %v476_v27  ;;  %v487_v21 = vmax.f32 %v424_v19, 0.0  ;;  %v1782_v27 = vld [vmem:[%s2817_s5 + $0x10] sm:$0xff]  ;;  %v447_v19 = vadd.f32 %v2277_v23, %v2335_v33 }
  0xa4   : > { %1037 = vmatpush.bf16.msrb.mxu3 %v1782_v27 }
  0xa5   : > { %634 = vmatmul.bf16.vlgmr.msrb.gmra.mxu1 %v508_v29  ;;  %723 = vmatmul.bf16.vlgmr.msrb.gmra.mxu2 %v508_v29  ;;  %v513_v24 = vpack.c.bf16 %v487_v21, %v486_v20  ;;  %v496_v25 = vmax.f32 %v447_v19, 0.0 }
  0xa6   : > { %v401_v30 = vpop.f32.mrf.mxu0 }
  0xa7   : > { %v402_v34 = vadd.f32 %v2277_v23, %v401_v30 }
  0xa8   : > { %v426_v62 = vpop.f32.mrf.mxu1  ;;  %v448_v41 = vpop.f32.mrf.mxu2 }
  0xa9   : > { %v478_v37 = vmax.f32 %v402_v34, 0.0  ;;  %v427_v28 = vadd.f32 %v2277_v23, %v426_v62  ;;  %v449_v20 = vadd.f32 %v2277_v23, %v448_v41 }
  0xab   : > { %v488_v31 = vmax.f32 %v427_v28, 0.0  ;;  %v497_v26 = vmax.f32 %v449_v20, 0.0 }
  0xad   : > { %v518_v33 = vpack.c.bf16 %v497_v26, %v496_v25 }
  0xae   : > { %v403_v35 = vpop.f32.mrf.mxu0 }
  0xaf   : > { %v404_v36 = vadd.f32 %v2277_v23, %v403_v35  ;;  %v1781_v35 = vld [vmem:[%s2817_s5 + $0x8] sm:$0xff] }
  0xb0   : > { %v428_v8 = vpop.f32.mrf.mxu1  ;;  %1038 = vmatpush.bf16.msrb.mxu3 %v1781_v35 }
  0xb1   : > { %v479_v38 = vmax.f32 %v404_v36, 0.0  ;;  %v429_v29 = vadd.f32 %v2277_v23, %v428_v8  ;;  %v1791_v36 = vld [vmem:[%s2817_s5 + $0x58] sm:$0xff] }
  0xb2   : > { %1125 = vmatpush.bf16.msrb.mxu0 %v1791_v36  ;;  %1804 = vmatpush.bf16.msra.mxu2 %v1791_v36 }
  0xb3   : > { %v509_v39 = vpack.c.bf16 %v479_v38, %v478_v37  ;;  %v489_v32 = vmax.f32 %v429_v29, 0.0  ;;  %v1790_v38 = vld [vmem:[%s2817_s5 + $0x50] sm:$0xff] }
  0xb4   : > { %1039 = vmatpush.bf16.msrb.mxu3 %v1780_v42 }
  0xb5   : > { %639 = vmatmul.bf16.gmra.mxu1 %v509_v39  ;;  %728 = vmatmul.bf16.gmra.mxu2 %v509_v39  ;;  %v514_v34 = vpack.c.bf16 %v489_v32, %v488_v31  ;;  %v456_v32 = vpop.f32.mrf.mxu3 }
  0xb6   : > { %v406_v40 = vpop.f32.mrf.mxu0  ;;  %1126 = vmatpush.bf16.msrb.mxu0 %v1790_v38  ;;  %1805 = vmatpush.bf16.msra.mxu2 %v1790_v38 }
  0xb7   : > { %v407_v44 = vadd.f32 %v2277_v23, %v406_v40 }
  0xb8   : > { %v431_v17 = vpop.f32.mrf.mxu1 }
  0xb9   : > { %v480_v48 = vmax.f32 %v407_v44, 0.0  ;;  %v432_v39 = vadd.f32 %v2277_v23, %v431_v17 }
  0xba   : > { %1127 = vmatpush.bf16.msrb.mxu0 %v1789_v43  ;;  %1806 = vmatpush.bf16.msra.mxu2 %v1789_v43 }
  0xbb   : > { %v490_v44 = vmax.f32 %v432_v39, 0.0 }
  0xbd   : > { %v458_v43 = vpop.f32.mrf.mxu3 }
  0xbe   : > { %v408_v45 = vpop.f32.mrf.mxu0  ;;  %1128 = vmatpush.bf16.msrb.mxu0 %v1788_v47  ;;  %1807 = vmatpush.bf16.msra.mxu2 %v1788_v47 }
  0xbf   : > { %v409_v46 = vadd.f32 %v2277_v23, %v408_v45 }
  0xc0   : > { %v433_v22 = vpop.f32.mrf.mxu1 }
  0xc1   : > { %v481_v49 = vmax.f32 %v409_v46, 0.0  ;;  %v434_v40 = vadd.f32 %v2277_v23, %v433_v22 }
  0xc3   : > { %v510_v50 = vpack.c.bf16 %v481_v49, %v480_v48  ;;  %v491_v45 = vmax.f32 %v434_v40, 0.0  ;;  %v2357_v49 = vpop.f32.mrf.mxu2 }
  0xc4   : > { %v452_v40 = vadd.f32 %v2277_v23, %v2357_v49 }
  0xc5   : > { %644 = vmatmul.bf16.gmra.mxu1 %v510_v50  ;;  %733 = vmatmul.bf16.gmra.mxu2 %v510_v50  ;;  %v515_v48 = vpack.c.bf16 %v491_v45, %v490_v44 }
  0xc6   : > { %v411_v53 = vpop.f32.mrf.mxu0 }
  0xc7   : > { %v412_v56 = vadd.f32 %v2277_v23, %v411_v53 }
  0xc8   : > { %v436_v30 = vpop.f32.mrf.mxu1 }
  0xc9   : > { %v482_v59 = vmax.f32 %v412_v56, 0.0  ;;  %v437_v51 = vadd.f32 %v2277_v23, %v436_v30  ;;  %v540_v56 = vld [vmem:[%s2816_s4] sm:$0x3] }
  0xca   : > { %v2369_v1 = vperm.slane %v540_v56, 1 }
  0xcb   : > { %v492_v53 = vmax.f32 %v437_v51, 0.0  ;;  %v453_v55 = vpop.f32.mrf.mxu2 }
  0xcc   : > { %v454_v41 = vadd.f32 %v2277_v23, %v453_v55 }
  0xce   : > { %v413_v57 = vpop.f32.mrf.mxu0  ;;  %v499_v47 = vmax.f32 %v454_v41, 0.0 }
  0xcf   : > { %v414_v58 = vadd.f32 %v2277_v23, %v413_v57 }
  0xd0   : > { %v438_v37 = vpop.f32.mrf.mxu1 }
  0xd1   : > { %v483_v60 = vmax.f32 %v414_v58, 0.0  ;;  %v439_v52 = vadd.f32 %v2277_v23, %v438_v37 }
  0xd3   : > { %v511_v61 = vpack.c.bf16 %v483_v60, %v482_v59  ;;  %v493_v54 = vmax.f32 %v439_v52, 0.0  ;;  %v2364_v59 = vperm.slane %v540_v56, 0 }
  0xd5   : > { %649 = vmatmul.bf16.gmra.mxu1 %v511_v61  ;;  %738 = vmatmul.bf16.gmra.mxu2 %v511_v61  ;;  %v516_v58 = vpack.c.bf16 %v493_v54, %v492_v53 }
  0xd6   : > { %v416_v2 = vpop.f32.mrf.mxu0 }
  0xd7   : > { %v417_v6 = vadd.f32 %v2277_v23, %v416_v2 }
  0xd8   : > { %v441_v46 = vpop.f32.mrf.mxu1 }
  0xd9   : > { %v484_v10 = vmax.f32 %v417_v6, 0.0  ;;  %v442_v63 = vadd.f32 %v2277_v23, %v441_v46  ;;  %v498_v46 = vmax.f32 %v452_v40, 0.0 }
  0xdb   : > { %v494_v5 = vmax.f32 %v442_v63, 0.0  ;;  %v519_v49 = vpack.c.bf16 %v499_v47, %v498_v46  ;;  %v459_v63 = vadd.f32 %v2277_v23, %v458_v43 }
  0xde   : > { %v418_v7 = vpop.f32.mrf.mxu0 }
  0xdf   : > { %v419_v9 = vadd.f32 %v2277_v23, %v418_v7 }
  0xe0   : > { %v443_v50 = vpop.f32.mrf.mxu1 }
  0xe1   : > { %v485_v11 = vmax.f32 %v419_v9, 0.0  ;;  %v444_v0 = vadd.f32 %v2277_v23, %v443_v50 }
  0xe3   : > { %v512_v12 = vpack.c.bf16 %v485_v11, %v484_v10  ;;  %v495_v6 = vmax.f32 %v444_v0, 0.0 }
  0xe5   : > { %654 = vmatmul.bf16.gmra.mxu1 %v512_v12  ;;  %743 = vmatmul.bf16.gmra.mxu2 %v512_v12  ;;  %v517_v14 = vpack.c.bf16 %v495_v6, %v494_v5  ;;  %v501_v5 = vmax.f32 %v459_v63, 0.0 }
  0xf5   : > { %659 = vmatmul.bf16.gmra.mxu1 %v513_v24  ;;  %748 = vmatmul.bf16.gmra.mxu2 %v513_v24 }
 0x105   : > { %664 = vmatmul.bf16.gmra.mxu1 %v514_v34  ;;  %753 = vmatmul.bf16.gmra.mxu2 %v514_v34 }
 0x115   : > { %669 = vmatmul.bf16.gmra.mxu1 %v515_v48  ;;  %758 = vmatmul.bf16.gmra.mxu2 %v515_v48 }
 0x122   : > { %v635_v57 = vpop.f32.mrf.mxu1 }
 0x123   : > { %v636_v61 = vadd.f32 %v635_v57, %v2364_v59  ;;  %v461_v57 = vpop.f32.mrf.mxu3 }
 0x124   : > { %v462_v20 = vadd.f32 %v2277_v23, %v461_v57 }
 0x125   : > { %674 = vmatmul.bf16.gmra.mxu1 %v516_v58  ;;  %763 = vmatmul.bf16.gmra.mxu2 %v516_v58  ;;  %v804_v3 = vmax.f32 %v636_v61, 0.0 }
 0x126   : > { %v502_v26 = vmax.f32 %v462_v20, 0.0 }
 0x128   : > { %v724_v60 = vpop.f32.mrf.mxu2 }
 0x129   : > { %v725_v7 = vadd.f32 %v724_v60, %v2369_v1 }
 0x12a   : > { %v637_v62 = vpop.f32.mrf.mxu1 }
 0x12b   : > { %v638_v2 = vadd.f32 %v637_v62, %v2364_v59  ;;  %v805_v12 = vmax.f32 %v725_v7, 0.0  ;;  %v457_v62 = vadd.f32 %v2277_v23, %v456_v32 }
 0x12d   : > { %v806_v4 = vmax.f32 %v638_v2, 0.0 }
 0x12f   : > { %v868_v8 = vpack.c.bf16 %v806_v4, %v804_v3  ;;  %v500_v4 = vmax.f32 %v457_v62, 0.0 }
 0x130   : > { %v726_v9 = vpop.f32.mrf.mxu2 }
 0x131   : > { %v727_v10 = vadd.f32 %v726_v9, %v2369_v1  ;;  %1040 = vmatmul.bf16.vlgmr.msrb.gmra.mxu3 %v868_v8  ;;  %v463_v9 = vpop.f32.mrf.mxu3 }
 0x132   : > { %v640_v11 = vpop.f32.mrf.mxu1 }
 0x133   : > { %v807_v13 = vmax.f32 %v727_v10, 0.0  ;;  %v641_v17 = vadd.f32 %v640_v11, %v2364_v59 }
 0x135   : > { %679 = vmatmul.bf16.gmra.mxu1 %v517_v14  ;;  %768 = vmatmul.bf16.gmra.mxu2 %v517_v14  ;;  %v869_v15 = vpack.c.bf16 %v807_v13, %v805_v12  ;;  %v808_v22 = vmax.f32 %v641_v17, 0.0  ;;  %v520_v14 = vpack.c.bf16 %v501_v5, %v500_v4 }
 0x137   : > { %1129 = vmatmul.bf16.vlgmr.msrb.gmra.mxu0 %v869_v15 }
 0x138   : > { %v729_v16 = vpop.f32.mrf.mxu2 }
 0x139   : > { %v730_v27 = vadd.f32 %v729_v16, %v2369_v1  ;;  %v466_v19 = vpop.f32.mrf.mxu3 }
 0x13a   : > { %v642_v18 = vpop.f32.mrf.mxu1  ;;  %v467_v41 = vadd.f32 %v2277_v23, %v466_v19 }
 0x13b   : > { %v643_v21 = vadd.f32 %v642_v18, %v2364_v59  ;;  %v809_v34 = vmax.f32 %v730_v27, 0.0 }
 0x13c   : > { %v504_v47 = vmax.f32 %v467_v41, 0.0 }
 0x13d   : > { %v810_v24 = vmax.f32 %v643_v21, 0.0  ;;  %v464_v21 = vadd.f32 %v2277_v23, %v463_v9 }
 0x13f   : > { %v870_v28 = vpack.c.bf16 %v810_v24, %v808_v22  ;;  %v503_v27 = vmax.f32 %v464_v21, 0.0 }
 0x140   : > { %v731_v29 = vpop.f32.mrf.mxu2 }
 0x141   : > { %v732_v30 = vadd.f32 %v731_v29, %v2369_v1  ;;  %1045 = vmatmul.bf16.gmra.mxu3 %v870_v28 }
 0x142   : > { %v645_v31 = vpop.f32.mrf.mxu1 }
 0x143   : > { %v811_v35 = vmax.f32 %v732_v30, 0.0  ;;  %v646_v38 = vadd.f32 %v645_v31, %v2364_v59 }
 0x145   : > { %684 = vmatmul.bf16.gmra.mxu1 %v518_v33  ;;  %773 = vmatmul.bf16.gmra.mxu2 %v518_v33  ;;  %v871_v36 = vpack.c.bf16 %v811_v35, %v809_v34  ;;  %v812_v44 = vmax.f32 %v646_v38, 0.0  ;;  %v521_v33 = vpack.c.bf16 %v503_v27, %v502_v26 }
 0x147   : > { %1134 = vmatmul.bf16.gmra.mxu0 %v871_v36  ;;  %v468_v36 = vpop.f32.mrf.mxu3 }
 0x148   : > { %v734_v37 = vpop.f32.mrf.mxu2 }
 0x149   : > { %v735_v48 = vadd.f32 %v734_v37, %v2369_v1 }
 0x14a   : > { %v647_v39 = vpop.f32.mrf.mxu1 }
 0x14b   : > { %v648_v42 = vadd.f32 %v647_v39, %v2364_v59  ;;  %v813_v54 = vmax.f32 %v735_v48, 0.0 }
 0x14d   : > { %v814_v45 = vmax.f32 %v648_v42, 0.0  ;;  %v469_v42 = vadd.f32 %v2277_v23, %v468_v36 }
 0x14f   : > { %v872_v50 = vpack.c.bf16 %v814_v45, %v812_v44  ;;  %v471_v46 = vpop.f32.mrf.mxu3  ;;  %v505_v48 = vmax.f32 %v469_v42, 0.0 }
 0x150   : > { %v736_v51 = vpop.f32.mrf.mxu2  ;;  %v472_v63 = vadd.f32 %v2277_v23, %v471_v46 }
 0x151   : > { %v737_v52 = vadd.f32 %v736_v51, %v2369_v1  ;;  %1050 = vmatmul.bf16.gmra.mxu3 %v872_v50 }
 0x152   : > { %v650_v53 = vpop.f32.mrf.mxu1  ;;  %v506_v5 = vmax.f32 %v472_v63, 0.0 }
 0x153   : > { %v815_v56 = vmax.f32 %v737_v52, 0.0  ;;  %v651_v60 = vadd.f32 %v650_v53, %v2364_v59 }
 0x155   : > { %689 = vmatmul.bf16.gmra.mxu1 %v519_v49  ;;  %778 = vmatmul.bf16.gmra.mxu2 %v519_v49  ;;  %v873_v55 = vpack.c.bf16 %v815_v56, %v813_v54  ;;  %v816_v2 = vmax.f32 %v651_v60, 0.0 }
 0x157   : > { %1139 = vmatmul.bf16.gmra.mxu0 %v873_v55  ;;  %v522_v55 = vpack.c.bf16 %v505_v48, %v504_v47 }
 0x158   : > { %v739_v58 = vpop.f32.mrf.mxu2 }
 0x159   : > { %v740_v6 = vadd.f32 %v739_v58, %v2369_v1  ;;  %v473_v58 = vpop.f32.mrf.mxu3 }
 0x15a   : > { %v652_v61 = vpop.f32.mrf.mxu1 }
 0x15b   : > { %v653_v0 = vadd.f32 %v652_v61, %v2364_v59  ;;  %v817_v12 = vmax.f32 %v740_v6, 0.0 }
 0x15d   : > { %v818_v3 = vmax.f32 %v653_v0, 0.0  ;;  %v474_v0 = vadd.f32 %v2277_v23, %v473_v58 }
 0x15f   : > { %v874_v7 = vpack.c.bf16 %v818_v3, %v816_v2  ;;  %v507_v6 = vmax.f32 %v474_v0, 0.0 }
 0x160   : > { %v741_v8 = vpop.f32.mrf.mxu2 }
 0x161   : > { %v742_v10 = vadd.f32 %v741_v8, %v2369_v1  ;;  %1055 = vmatmul.bf16.gmra.mxu3 %v874_v7 }
 0x162   : > { %v655_v11 = vpop.f32.mrf.mxu1 }
 0x163   : > { %v819_v13 = vmax.f32 %v742_v10, 0.0  ;;  %v656_v17 = vadd.f32 %v655_v11, %v2364_v59 }
 0x165   : > { %694 = vmatmul.bf16.gmra.mxu1 %v520_v14  ;;  %783 = vmatmul.bf16.gmra.mxu2 %v520_v14  ;;  %v875_v15 = vpack.c.bf16 %v819_v13, %v817_v12  ;;  %v820_v24 = vmax.f32 %v656_v17, 0.0  ;;  %v523_v14 = vpack.c.bf16 %v507_v6, %v506_v5 }
 0x167   : > { %1144 = vmatmul.bf16.gmra.mxu0 %v875_v15 }
 0x168   : > { %v744_v16 = vpop.f32.mrf.mxu2 }
 0x169   : > { %v745_v28 = vadd.f32 %v744_v16, %v2369_v1 }
 0x16a   : > { %v657_v18 = vpop.f32.mrf.mxu1 }
 0x16b   : > { %v658_v22 = vadd.f32 %v657_v18, %v2364_v59  ;;  %v821_v34 = vmax.f32 %v745_v28, 0.0 }
 0x16d   : > { %v822_v25 = vmax.f32 %v658_v22, 0.0 }
 0x16f   : > { %v876_v29 = vpack.c.bf16 %v822_v25, %v820_v24 }
 0x170   : > { %v746_v30 = vpop.f32.mrf.mxu2 }
 0x171   : > { %v747_v31 = vadd.f32 %v746_v30, %v2369_v1  ;;  %1060 = vmatmul.bf16.gmra.mxu3 %v876_v29 }
 0x172   : > { %v660_v32 = vpop.f32.mrf.mxu1 }
 0x173   : > { %v823_v35 = vmax.f32 %v747_v31, 0.0  ;;  %v661_v39 = vadd.f32 %v660_v32, %v2364_v59 }
 0x175   : > { %699 = vmatmul.bf16.gmra.mxu1 %v521_v33  ;;  %788 = vmatmul.bf16.gmra.mxu2 %v521_v33  ;;  %v877_v37 = vpack.c.bf16 %v823_v35, %v821_v34  ;;  %v824_v44 = vmax.f32 %v661_v39, 0.0 }
 0x177   : > { %1149 = vmatmul.bf16.gmra.mxu0 %v877_v37 }
 0x178   : > { %v749_v38 = vpop.f32.mrf.mxu2 }
 0x179   : > { %v750_v50 = vadd.f32 %v749_v38, %v2369_v1 }
 0x17a   : > { %v662_v40 = vpop.f32.mrf.mxu1 }
 0x17b   : > { %v663_v43 = vadd.f32 %v662_v40, %v2364_v59  ;;  %v825_v56 = vmax.f32 %v750_v50, 0.0  ;;  %v2423_v40 = vld [vmem:[%s2818_s6] ss:$0 sm:$0xff] }
 0x17d   : > { %v826_v45 = vmax.f32 %v663_v43, 0.0 }
 0x17f   : > { %v878_v51 = vpack.c.bf16 %v826_v45, %v824_v44 }
 0x180   : > { %v751_v52 = vpop.f32.mrf.mxu2 }
 0x181   : > { %v752_v53 = vadd.f32 %v751_v52, %v2369_v1  ;;  %1065 = vmatmul.bf16.gmra.mxu3 %v878_v51 }
 0x182   : > { %v665_v54 = vpop.f32.mrf.mxu1 }
 0x183   : > { %v827_v49 = vmax.f32 %v752_v53, 0.0  ;;  %v666_v61 = vadd.f32 %v665_v54, %v2364_v59 }
 0x185   : > { %704 = vmatmul.bf16.gmra.mxu1 %v522_v55  ;;  %793 = vmatmul.bf16.gmra.mxu2 %v522_v55  ;;  %v879_v57 = vpack.c.bf16 %v827_v49, %v825_v56  ;;  %v828_v3 = vmax.f32 %v666_v61, 0.0 }
 0x187   : > { %1154 = vmatmul.bf16.gmra.mxu0 %v879_v57 }
 0x188   : > { %v754_v60 = vpop.f32.mrf.mxu2 }
 0x189   : > { %v755_v7 = vadd.f32 %v754_v60, %v2369_v1 }
 0x18a   : > { %v667_v62 = vpop.f32.mrf.mxu1 }
 0x18b   : > { %v668_v2 = vadd.f32 %v667_v62, %v2364_v59  ;;  %v829_v12 = vmax.f32 %v755_v7, 0.0 }
 0x18d   : > { %v830_v4 = vmax.f32 %v668_v2, 0.0 }
 0x18f   : > { %v880_v8 = vpack.c.bf16 %v830_v4, %v828_v3 }
 0x190   : > { %v756_v9 = vpop.f32.mrf.mxu2 }
 0x191   : > { %v757_v10 = vadd.f32 %v756_v9, %v2369_v1  ;;  %1070 = vmatmul.bf16.gmra.mxu3 %v880_v8 }
 0x192   : > { %v670_v11 = vpop.f32.mrf.mxu1 }
 0x193   : > { %v831_v13 = vmax.f32 %v757_v10, 0.0  ;;  %v671_v16 = vadd.f32 %v670_v11, %v2364_v59 }
 0x195   : > { %709 = vmatmul.bf16.gmra.mxu1 %v523_v14  ;;  %798 = vmatmul.bf16.gmra.mxu2 %v523_v14  ;;  %v881_v23 = vpack.c.bf16 %v831_v13, %v829_v12  ;;  %v832_v19 = vmax.f32 %v671_v16, 0.0 }
 0x197   : > { %1159 = vmatmul.bf16.gmra.mxu0 %v881_v23 }
 0x198   : > { %v759_v15 = vpop.f32.mrf.mxu2 }
 0x199   : > { %v760_v21 = vadd.f32 %v759_v15, %v2369_v1 }
 0x19a   : > { %v672_v17 = vpop.f32.mrf.mxu1 }
 0x19b   : > { %v673_v18 = vadd.f32 %v672_v17, %v2364_v59  ;;  %v833_v27 = vmax.f32 %v760_v21, 0.0 }
 0x19d   : > { %v834_v20 = vmax.f32 %v673_v18, 0.0 }
 0x19f   : > { %v882_v22 = vpack.c.bf16 %v834_v20, %v832_v19 }
 0x1a0   : > { %v761_v24 = vpop.f32.mrf.mxu2 }
 0x1a1   : > { %v762_v25 = vadd.f32 %v761_v24, %v2369_v1  ;;  %1075 = vmatmul.bf16.gmra.mxu3 %v882_v22 }
 0x1a2   : > { %v675_v26 = vpop.f32.mrf.mxu1 }
 0x1a3   : > { %v835_v28 = vmax.f32 %v762_v25, 0.0  ;;  %v676_v31 = vadd.f32 %v675_v26, %v2364_v59 }
 0x1a5   : > { %v883_v29 = vpack.c.bf16 %v835_v28, %v833_v27  ;;  %v836_v35 = vmax.f32 %v676_v31, 0.0 }
 0x1a7   : > { %1164 = vmatmul.bf16.gmra.mxu0 %v883_v29 }
 0x1a8   : > { %v764_v30 = vpop.f32.mrf.mxu2 }
 0x1a9   : > { %v765_v36 = vadd.f32 %v764_v30, %v2369_v1 }
 0x1aa   : > { %v677_v32 = vpop.f32.mrf.mxu1 }
 0x1ab   : > { %v678_v34 = vadd.f32 %v677_v32, %v2364_v59  ;;  %v837_v42 = vmax.f32 %v765_v36, 0.0 }
 0x1ad   : > { %v838_v33 = vmax.f32 %v678_v34, 0.0 }
 0x1af   : > { %v884_v37 = vpack.c.bf16 %v838_v33, %v836_v35 }
 0x1b0   : > { %v766_v38 = vpop.f32.mrf.mxu2 }
 0x1b1   : > { %v767_v39 = vadd.f32 %v766_v38, %v2369_v1  ;;  %1080 = vmatmul.bf16.gmra.mxu3 %v884_v37 }
 0x1b2   : > { %v680_v41 = vpop.f32.mrf.mxu1 }
 0x1b3   : > { %v839_v43 = vmax.f32 %v767_v39, 0.0  ;;  %v681_v51 = vadd.f32 %v680_v41, %v2364_v59 }
 0x1b4   : > { %v1041_v44 = vpop.f32.mrf.mxu3  ;;  %v1130_v45 = vpop.f32.mrf.mxu0 }
 0x1b5   : > { %v885_v46 = vpack.c.bf16 %v839_v43, %v837_v42  ;;  %v1042_v47 = vadd.f32 %v2423_v40, %v1041_v44  ;;  %v840_v49 = vmax.f32 %v681_v51, 0.0 }
 0x1b7   : > { %v2426_v48 = vadd.f32 %v1130_v45, %v1042_v47  ;;  %1169 = vmatmul.bf16.gmra.mxu0 %v885_v46 }
 0x1b8   : > { %v769_v50 = vpop.f32.mrf.mxu2 }
 0x1b9   : > { %1210 = vmax.xlane.f32.xlu0 %v2426_v48  ;;  %v770_v58 = vadd.f32 %v769_v50, %v2369_v1 }
 0x1ba   : > { %v682_v52 = vpop.f32.mrf.mxu1 }
 0x1bb   : > { %v683_v53 = vadd.f32 %v682_v52, %v2364_v59  ;;  %v841_v2 = vmax.f32 %v770_v58, 0.0 }
 0x1bc   : > { %v1043_v54 = vpop.f32.mrf.mxu3  ;;  %v1132_v56 = vpop.f32.mrf.mxu0 }
 0x1bd   : > { %v842_v55 = vmax.f32 %v683_v53, 0.0  ;;  %v1044_v57 = vadd.f32 %v2423_v40, %v1043_v54 }
 0x1bf   : > { %v886_v60 = vpack.c.bf16 %v842_v55, %v840_v49  ;;  %v2433_v61 = vadd.f32 %v1132_v56, %v1044_v57 }
 0x1c0   : > { %v771_v62 = vpop.f32.mrf.mxu2 }
 0x1c1   : > { %v772_v63 = vadd.f32 %v771_v62, %v2369_v1  ;;  %1085 = vmatmul.bf16.gmra.mxu3 %v886_v60  ;;  %1212 = vmax.xlane.f32.xlu0 %v2433_v61 }
 0x1c2   : > { %v685_v0 = vpop.f32.mrf.mxu1 }
 0x1c3   : > { %v843_v3 = vmax.f32 %v772_v63, 0.0  ;;  %v686_v10 = vadd.f32 %v685_v0, %v2364_v59 }
 0x1c4   : > { %v1046_v4 = vpop.f32.mrf.mxu3  ;;  %v1135_v5 = vpop.f32.mrf.mxu0 }
 0x1c5   : > { %v887_v6 = vpack.c.bf16 %v843_v3, %v841_v2  ;;  %v1047_v7 = vadd.f32 %v2423_v40, %v1046_v4  ;;  %v844_v23 = vmax.f32 %v686_v10, 0.0 }
 0x1c7   : > { %v2438_v8 = vadd.f32 %v1135_v5, %v1047_v7  ;;  %1174 = vmatmul.bf16.gmra.mxu0 %v887_v6 }
 0x1c8   : > { %v774_v9 = vpop.f32.mrf.mxu2 }
 0x1c9   : > { %1214 = vmax.xlane.f32.xlu1 %v2438_v8  ;;  %v775_v17 = vadd.f32 %v774_v9, %v2369_v1 }
 0x1ca   : > { %v687_v11 = vpop.f32.mrf.mxu1 }
 0x1cb   : > { %v688_v12 = vadd.f32 %v687_v11, %v2364_v59  ;;  %v845_v24 = vmax.f32 %v775_v17, 0.0 }
 0x1cc   : > { %v1048_v13 = vpop.f32.mrf.mxu3  ;;  %v1137_v14 = vpop.f32.mrf.mxu0 }
 0x1cd   : > { %v846_v15 = vmax.f32 %v688_v12, 0.0  ;;  %v1049_v16 = vadd.f32 %v2423_v40, %v1048_v13 }
 0x1cf   : > { %v888_v18 = vpack.c.bf16 %v846_v15, %v844_v23  ;;  %v2445_v19 = vadd.f32 %v1137_v14, %v1049_v16 }
 0x1d0   : > { %v776_v20 = vpop.f32.mrf.mxu2 }
 0x1d1   : > { %v777_v21 = vadd.f32 %v776_v20, %v2369_v1  ;;  %1090 = vmatmul.bf16.gmra.mxu3 %v888_v18  ;;  %1216 = vmax.xlane.f32.xlu1 %v2445_v19 }
 0x1d2   : > { %v690_v22 = vpop.f32.mrf.mxu1 }
 0x1d3   : > { %v847_v25 = vmax.f32 %v777_v21, 0.0  ;;  %v691_v32 = vadd.f32 %v690_v22, %v2364_v59 }
 0x1d4   : > { %v1051_v26 = vpop.f32.mrf.mxu3  ;;  %v1140_v27 = vpop.f32.mrf.mxu0 }
 0x1d5   : > { %v889_v28 = vpack.c.bf16 %v847_v25, %v845_v24  ;;  %v1052_v29 = vadd.f32 %v2423_v40, %v1051_v26  ;;  %v848_v37 = vmax.f32 %v691_v32, 0.0 }
 0x1d7   : > { %v2450_v30 = vadd.f32 %v1140_v27, %v1052_v29  ;;  %1179 = vmatmul.bf16.gmra.mxu0 %v889_v28 }
 0x1d8   : > { %v779_v31 = vpop.f32.mrf.mxu2 }
 0x1d9   : > { %1218 = vmax.xlane.f32.xlu2 %v2450_v30  ;;  %v780_v41 = vadd.f32 %v779_v31, %v2369_v1 }
 0x1da   : > { %v692_v34 = vpop.f32.mrf.mxu1 }
 0x1db   : > { %v693_v35 = vadd.f32 %v692_v34, %v2364_v59  ;;  %v849_v47 = vmax.f32 %v780_v41, 0.0 }
 0x1dc   : > { %v1053_v33 = vpop.f32.mrf.mxu3  ;;  %v1142_v36 = vpop.f32.mrf.mxu0 }
 0x1dd   : > { %v850_v38 = vmax.f32 %v693_v35, 0.0  ;;  %v1054_v39 = vadd.f32 %v2423_v40, %v1053_v33 }
 0x1df   : > { %v890_v42 = vpack.c.bf16 %v850_v38, %v848_v37  ;;  %v2457_v43 = vadd.f32 %v1142_v36, %v1054_v39 }
 0x1e0   : > { %v781_v44 = vpop.f32.mrf.mxu2 }
 0x1e1   : > { %v782_v45 = vadd.f32 %v781_v44, %v2369_v1  ;;  %1095 = vmatmul.bf16.gmra.mxu3 %v890_v42  ;;  %1220 = vmax.xlane.f32.xlu2 %v2457_v43 }
 0x1e2   : > { %v695_v46 = vpop.f32.mrf.mxu1 }
 0x1e3   : > { %v851_v50 = vmax.f32 %v782_v45, 0.0  ;;  %v696_v55 = vadd.f32 %v695_v46, %v2364_v59 }
 0x1e4   : > { %v1056_v51 = vpop.f32.mrf.mxu3  ;;  %v1145_v52 = vpop.f32.mrf.mxu0 }
 0x1e5   : > { %v891_v53 = vpack.c.bf16 %v851_v50, %v849_v47  ;;  %v1057_v54 = vadd.f32 %v2423_v40, %v1056_v51  ;;  %v852_v63 = vmax.f32 %v696_v55, 0.0 }
 0x1e7   : > { %v2462_v56 = vadd.f32 %v1145_v52, %v1057_v54  ;;  %1184 = vmatmul.bf16.gmra.mxu0 %v891_v53 }
 0x1e8   : > { %v784_v49 = vpop.f32.mrf.mxu2 }
 0x1e9   : > { %1222 = vmax.xlane.f32.xlu0 %v2462_v56  ;;  %v785_v3 = vadd.f32 %v784_v49, %v2369_v1 }
 0x1ea   : > { %v697_v57 = vpop.f32.mrf.mxu1 }
 0x1eb   : > { %v698_v58 = vadd.f32 %v697_v57, %v2364_v59  ;;  %v853_v10 = vmax.f32 %v785_v3, 0.0 }
 0x1ec   : > { %v1058_v60 = vpop.f32.mrf.mxu3  ;;  %v1147_v62 = vpop.f32.mrf.mxu0 }
 0x1ed   : > { %v854_v0 = vmax.f32 %v698_v58, 0.0  ;;  %v1059_v2 = vadd.f32 %v2423_v40, %v1058_v60 }
 0x1ef   : > { %v892_v4 = vpack.c.bf16 %v854_v0, %v852_v63  ;;  %v2469_v5 = vadd.f32 %v1147_v62, %v1059_v2 }
 0x1f0   : > { %v786_v6 = vpop.f32.mrf.mxu2 }
 0x1f1   : > { %v787_v7 = vadd.f32 %v786_v6, %v2369_v1  ;;  %1100 = vmatmul.bf16.gmra.mxu3 %v892_v4  ;;  %1224 = vmax.xlane.f32.xlu1 %v2469_v5 }
 0x1f2   : > { %v700_v9 = vpop.f32.mrf.mxu1 }
 0x1f3   : > { %v855_v11 = vmax.f32 %v787_v7, 0.0  ;;  %v701_v17 = vadd.f32 %v700_v9, %v2364_v59 }
 0x1f4   : > { %v1061_v12 = vpop.f32.mrf.mxu3  ;;  %v1150_v13 = vpop.f32.mrf.mxu0 }
 0x1f5   : > { %v893_v14 = vpack.c.bf16 %v855_v11, %v853_v10  ;;  %v1062_v23 = vadd.f32 %v2423_v40, %v1061_v12  ;;  %v856_v24 = vmax.f32 %v701_v17, 0.0 }
 0x1f7   : > { %v2474_v15 = vadd.f32 %v1150_v13, %v1062_v23  ;;  %1189 = vmatmul.bf16.gmra.mxu0 %v893_v14 }
 0x1f8   : > { %v789_v16 = vpop.f32.mrf.mxu2 }
 0x1f9   : > { %1226 = vmax.xlane.f32.xlu2 %v2474_v15  ;;  %v790_v27 = vadd.f32 %v789_v16, %v2369_v1 }
 0x1fa   : > { %v702_v18 = vpop.f32.mrf.mxu1 }
 0x1fb   : > { %v703_v20 = vadd.f32 %v702_v18, %v2364_v59  ;;  %v857_v35 = vmax.f32 %v790_v27, 0.0 }
 0x1fc   : > { %v1063_v21 = vpop.f32.mrf.mxu3  ;;  %v1152_v22 = vpop.f32.mrf.mxu0 }
 0x1fd   : > { %v858_v25 = vmax.f32 %v703_v20, 0.0  ;;  %v1064_v26 = vadd.f32 %v2423_v40, %v1063_v21 }
 0x1ff   : > { %v894_v28 = vpack.c.bf16 %v858_v25, %v856_v24  ;;  %v2481_v29 = vadd.f32 %v1152_v22, %v1064_v26 }
 0x200   : > { %v791_v31 = vpop.f32.mrf.mxu2 }
 0x201   : > { %v792_v32 = vadd.f32 %v791_v31, %v2369_v1  ;;  %1105 = vmatmul.bf16.gmra.mxu3 %v894_v28  ;;  %1228 = vmax.xlane.f32.xlu0 %v2481_v29 }
 0x202   : > { %v705_v34 = vpop.f32.mrf.mxu1 }
 0x203   : > { %v859_v33 = vmax.f32 %v792_v32, 0.0  ;;  %v706_v44 = vadd.f32 %v705_v34, %v2364_v59 }
 0x204   : > { %v1066_v36 = vpop.f32.mrf.mxu3  ;;  %v1155_v37 = vpop.f32.mrf.mxu0 }
 0x205   : > { %v895_v38 = vpack.c.bf16 %v859_v33, %v857_v35  ;;  %v1067_v39 = vadd.f32 %v2423_v40, %v1066_v36  ;;  %v860_v51 = vmax.f32 %v706_v44, 0.0 }
 0x207   : > { %v2486_v41 = vadd.f32 %v1155_v37, %v1067_v39  ;;  %1194 = vmatmul.bf16.gmra.mxu0 %v895_v38 }
 0x208   : > { %v794_v42 = vpop.f32.mrf.mxu2 }
 0x209   : > { %1230 = vmax.xlane.f32.xlu1 %v2486_v41  ;;  %v795_v54 = vadd.f32 %v794_v42, %v2369_v1 }
 0x20a   : > { %v707_v45 = vpop.f32.mrf.mxu1 }
 0x20b   : > { %v708_v46 = vadd.f32 %v707_v45, %v2364_v59  ;;  %v861_v62 = vmax.f32 %v795_v54, 0.0 }
 0x20c   : > { %v1068_v47 = vpop.f32.mrf.mxu3  ;;  %v1157_v50 = vpop.f32.mrf.mxu0 }
 0x20d   : > { %v862_v52 = vmax.f32 %v708_v46, 0.0  ;;  %v1069_v53 = vadd.f32 %v2423_v40, %v1068_v47 }
 0x20f   : > { %v896_v49 = vpack.c.bf16 %v862_v52, %v860_v51  ;;  %v2493_v55 = vadd.f32 %v1157_v50, %v1069_v53 }
 0x210   : > { %v796_v57 = vpop.f32.mrf.mxu2 }
 0x211   : > { %v797_v58 = vadd.f32 %v796_v57, %v2369_v1  ;;  %1110 = vmatmul.bf16.gmra.mxu3 %v896_v49  ;;  %1232 = vmax.xlane.f32.xlu2 %v2493_v55 }
 0x212   : > { %v710_v60 = vpop.f32.mrf.mxu1 }
 0x213   : > { %v863_v63 = vmax.f32 %v797_v58, 0.0  ;;  %v711_v9 = vadd.f32 %v710_v60, %v2364_v59 }
 0x214   : > { %v1071_v0 = vpop.f32.mrf.mxu3  ;;  %v1160_v2 = vpop.f32.mrf.mxu0 }
 0x215   : > { %v897_v3 = vpack.c.bf16 %v863_v63, %v861_v62  ;;  %v1072_v4 = vadd.f32 %v2423_v40, %v1071_v0  ;;  %v864_v14 = vmax.f32 %v711_v9, 0.0 }
 0x217   : > { %v2498_v6 = vadd.f32 %v1160_v2, %v1072_v4  ;;  %1199 = vmatmul.bf16.gmra.mxu0 %v897_v3 }
 0x218   : > { %v799_v7 = vpop.f32.mrf.mxu2 }
 0x219   : > { %1234 = vmax.xlane.f32.xlu0 %v2498_v6  ;;  %v800_v17 = vadd.f32 %v799_v7, %v2369_v1 }
 0x21a   : > { %v712_v10 = vpop.f32.mrf.mxu1 }
 0x21b   : > { %v713_v11 = vadd.f32 %v712_v10, %v2364_v59  ;;  %v865_v24 = vmax.f32 %v800_v17, 0.0 }
 0x21c   : > { %v1073_v12 = vpop.f32.mrf.mxu3  ;;  %v1162_v13 = vpop.f32.mrf.mxu0 }
 0x21d   : > { %v866_v23 = vmax.f32 %v713_v11, 0.0  ;;  %v1074_v16 = vadd.f32 %v2423_v40, %v1073_v12 }
 0x21f   : > { %v898_v18 = vpack.c.bf16 %v866_v23, %v864_v14  ;;  %v2505_v20 = vadd.f32 %v1162_v13, %v1074_v16 }
 0x220   : > { %v801_v21 = vpop.f32.mrf.mxu2 }
 0x221   : > { %v802_v22 = vadd.f32 %v801_v21, %v2369_v1  ;;  %1115 = vmatmul.bf16.gmra.mxu3 %v898_v18  ;;  %1236 = vmax.xlane.f32.xlu1 %v2505_v20 }
 0x223   : > { %v867_v25 = vmax.f32 %v802_v22, 0.0 }
 0x224   : > { %v1076_v59 = vpop.f32.mrf.mxu3  ;;  %v1165_v26 = vpop.f32.mrf.mxu0 }
 0x225   : > { %v899_v27 = vpack.c.bf16 %v867_v25, %v865_v24  ;;  %v1077_v28 = vadd.f32 %v2423_v40, %v1076_v59 }
 0x227   : > { %v2510_v31 = vadd.f32 %v1165_v26, %v1077_v28  ;;  %1204 = vmatmul.bf16.vlgmr.msra.gmra.mxu2 %v899_v27 }
 0x229   : > { %1238 = vmax.xlane.f32.xlu2 %v2510_v31 }
 0x22c   : > { %v1078_v32 = vpop.f32.mrf.mxu3  ;;  %v1167_v34 = vpop.f32.mrf.mxu0 }
 0x22d   : > { %v1079_v35 = vadd.f32 %v2423_v40, %v1078_v32  ;;  %v1211_v1 = vpop.xlane.xlu0 %1210 }
 0x22e   : > { %v1274_v33 = vsub.f32 %v2426_v48, %v1211_v1 }
 0x22f   : > { %v2515_v36 = vadd.f32 %v1167_v34, %v1079_v35 }
 0x230   : > { %v1306_v37 = vmul.f32 1.442695, %v1274_v33 }
 0x231   : > { %1240 = vmax.xlane.f32.xlu0 %v2515_v36 }
 0x232   : > { %1851 = vpow2.f32 %v1306_v37 }
 0x234   : > { %v1081_v38 = vpop.f32.mrf.mxu3  ;;  %v1170_v39 = vpop.f32.mrf.mxu0 }
 0x235   : > { %v1082_v42 = vadd.f32 %v2423_v40, %v1081_v38  ;;  %v1213_v44 = vpop.xlane.xlu0 %1212 }
 0x236   : > { %v1275_v45 = vsub.f32 %v2433_v61, %v1213_v44 }
 0x237   : > { %v2520_v46 = vadd.f32 %v1170_v39, %v1082_v42 }
 0x238   : > { %v2522_v47 = vpop.eup %1851  ;;  %v1308_v50 = vmul.f32 1.442695, %v1275_v45 }
 0x239   : > { %1370 = vadd.xlane.f32.xlu2 %v2522_v47  ;;  %1242 = vmax.xlane.f32.xlu1 %v2520_v46 }
 0x23a   : > { %1853 = vpow2.f32 %v1308_v50 }
 0x23c   : > { %v1083_v48 = vpop.f32.mrf.mxu3  ;;  %v1172_v51 = vpop.f32.mrf.mxu0 }
 0x23d   : > { %v1084_v52 = vadd.f32 %v2423_v40, %v1083_v48  ;;  %v1215_v53 = vpop.xlane.xlu1 %1214 }
 0x23e   : > { %v1276_v54 = vsub.f32 %v2438_v8, %v1215_v53 }
 0x23f   : > { %v2528_v49 = vadd.f32 %v1172_v51, %v1084_v52 }
 0x240   : > { %v2530_v61 = vpop.eup %1853  ;;  %v1310_v57 = vmul.f32 1.442695, %v1276_v54 }
 0x241   : > { %1372 = vadd.xlane.f32.xlu0 %v2530_v61  ;;  %1244 = vmax.xlane.f32.xlu2 %v2528_v49 }
 0x242   : > { %1855 = vpow2.f32 %v1310_v57 }
 0x244   : > { %v1086_v58 = vpop.f32.mrf.mxu3  ;;  %v1175_v60 = vpop.f32.mrf.mxu0 }
 0x245   : > { %v1087_v62 = vadd.f32 %v2423_v40, %v1086_v58  ;;  %v1217_v63 = vpop.xlane.xlu1 %1216 }
 0x246   : > { %v1277_v0 = vsub.f32 %v2445_v19, %v1217_v63 }
 0x247   : > { %v2536_v2 = vadd.f32 %v1175_v60, %v1087_v62 }
 0x248   : > { %v2538_v8 = vpop.eup %1855  ;;  %v1312_v3 = vmul.f32 1.442695, %v1277_v0 }
 0x249   : > { %1374 = vadd.xlane.f32.xlu1 %v2538_v8  ;;  %1246 = vmax.xlane.f32.xlu0 %v2536_v2 }
 0x24a   : > { %1857 = vpow2.f32 %v1312_v3 }
 0x24c   : > { %v1088_v4 = vpop.f32.mrf.mxu3  ;;  %v1177_v7 = vpop.f32.mrf.mxu0 }
 0x24d   : > { %v1089_v9 = vadd.f32 %v2423_v40, %v1088_v4  ;;  %v1219_v10 = vpop.xlane.xlu2 %1218 }
 0x24e   : > { %v1278_v11 = vsub.f32 %v2450_v30, %v1219_v10 }
 0x24f   : > { %v2544_v12 = vadd.f32 %v1177_v7, %v1089_v9 }
 0x250   : > { %v2546_v19 = vpop.eup %1857  ;;  %v1314_v13 = vmul.f32 1.442695, %v1278_v11 }
 0x251   : > { %1376 = vadd.xlane.f32.xlu2 %v2546_v19  ;;  %1248 = vmax.xlane.f32.xlu1 %v2544_v12 }
 0x252   : > { %1859 = vpow2.f32 %v1314_v13 }
 0x254   : > { %v1091_v14 = vpop.f32.mrf.mxu3  ;;  %v1180_v23 = vpop.f32.mrf.mxu0 }
 0x255   : > { %v1092_v16 = vadd.f32 %v2423_v40, %v1091_v14  ;;  %v1221_v17 = vpop.xlane.xlu2 %1220 }
 0x256   : > { %v1279_v18 = vsub.f32 %v2457_v43, %v1221_v17 }
 0x257   : > { %v2552_v21 = vadd.f32 %v1180_v23, %v1092_v16 }
 0x258   : > { %v2554_v30 = vpop.eup %1859  ;;  %v1316_v22 = vmul.f32 1.442695, %v1279_v18 }
 0x259   : > { %1378 = vadd.xlane.f32.xlu0 %v2554_v30  ;;  %1250 = vmax.xlane.f32.xlu2 %v2552_v21 }
 0x25a   : > { %1861 = vpow2.f32 %v1316_v22 }
 0x25c   : > { %v1093_v24 = vpop.f32.mrf.mxu3  ;;  %v1182_v25 = vpop.f32.mrf.mxu0 }
 0x25d   : > { %v1094_v59 = vadd.f32 %v2423_v40, %v1093_v24  ;;  %v1223_v26 = vpop.xlane.xlu0 %1222 }
 0x25e   : > { %v1280_v27 = vsub.f32 %v2462_v56, %v1223_v26 }
 0x25f   : > { %v2560_v28 = vadd.f32 %v1182_v25, %v1094_v59 }
 0x260   : > { %v2562_v43 = vpop.eup %1861  ;;  %v1318_v32 = vmul.f32 1.442695, %v1280_v27 }
 0x261   : > { %1380 = vadd.xlane.f32.xlu1 %v2562_v43  ;;  %1252 = vmax.xlane.f32.xlu0 %v2560_v28 }
 0x262   : > { %1863 = vpow2.f32 %v1318_v32 }
 0x264   : > { %v1096_v34 = vpop.f32.mrf.mxu3  ;;  %v1185_v35 = vpop.f32.mrf.mxu0 }
 0x265   : > { %v1097_v1 = vadd.f32 %v2423_v40, %v1096_v34  ;;  %v1225_v33 = vpop.xlane.xlu1 %1224 }
 0x266   : > { %v1281_v37 = vsub.f32 %v2469_v5, %v1225_v33 }
 0x267   : > { %v2568_v38 = vadd.f32 %v1185_v35, %v1097_v1 }
 0x268   : > { %v2570_v56 = vpop.eup %1863  ;;  %v1320_v39 = vmul.f32 1.442695, %v1281_v37 }
 0x269   : > { %1382 = vadd.xlane.f32.xlu2 %v2570_v56  ;;  %1254 = vmax.xlane.f32.xlu1 %v2568_v38 }
 0x26a   : > { %1865 = vpow2.f32 %v1320_v39 }
 0x26c   : > { %v1098_v42 = vpop.f32.mrf.mxu3  ;;  %v1187_v44 = vpop.f32.mrf.mxu0 }
 0x26d   : > { %v1099_v45 = vadd.f32 %v2423_v40, %v1098_v42  ;;  %v1227_v50 = vpop.xlane.xlu2 %1226 }
 0x26e   : > { %v1282_v48 = vsub.f32 %v2474_v15, %v1227_v50 }
 0x26f   : > { %v2576_v51 = vadd.f32 %v1187_v44, %v1099_v45 }
 0x270   : > { %v2578_v5 = vpop.eup %1865  ;;  %v1322_v52 = vmul.f32 1.442695, %v1282_v48 }
 0x271   : > { %1384 = vadd.xlane.f32.xlu0 %v2578_v5  ;;  %1256 = vmax.xlane.f32.xlu2 %v2576_v51 }
 0x272   : > { %1867 = vpow2.f32 %v1322_v52 }
 0x274   : > { %v1101_v53 = vpop.f32.mrf.mxu3  ;;  %v1190_v54 = vpop.f32.mrf.mxu0 }
 0x275   : > { %v1102_v57 = vadd.f32 %v2423_v40, %v1101_v53  ;;  %v1229_v58 = vpop.xlane.xlu0 %1228 }
 0x276   : > { %v1283_v60 = vsub.f32 %v2481_v29, %v1229_v58 }
 0x277   : > { %v2584_v62 = vadd.f32 %v1190_v54, %v1102_v57 }
 0x278   : > { %v2586_v15 = vpop.eup %1867  ;;  %v1324_v63 = vmul.f32 1.442695, %v1283_v60 }
 0x279   : > { %1386 = vadd.xlane.f32.xlu1 %v2586_v15  ;;  %1258 = vmax.xlane.f32.xlu0 %v2584_v62 }
 0x27a   : > { %1869 = vpow2.f32 %v1324_v63 }
 0x27c   : > { %v1103_v0 = vpop.f32.mrf.mxu3  ;;  %v1192_v3 = vpop.f32.mrf.mxu0 }
 0x27d   : > { %v1104_v4 = vadd.f32 %v2423_v40, %v1103_v0  ;;  %v1231_v7 = vpop.xlane.xlu1 %1230 }
 0x27e   : > { %v1284_v9 = vsub.f32 %v2486_v41, %v1231_v7 }
 0x27f   : > { %v2592_v10 = vadd.f32 %v1192_v3, %v1104_v4 }
 0x280   : > { %v2594_v29 = vpop.eup %1869  ;;  %v1326_v11 = vmul.f32 1.442695, %v1284_v9 }
 0x281   : > { %1388 = vadd.xlane.f32.xlu2 %v2594_v29  ;;  %1260 = vmax.xlane.f32.xlu1 %v2592_v10 }
 0x282   : > { %1871 = vpow2.f32 %v1326_v11 }
 0x284   : > { %v1106_v13 = vpop.f32.mrf.mxu3  ;;  %v1195_v14 = vpop.f32.mrf.mxu0 }
 0x285   : > { %v1107_v23 = vadd.f32 %v2423_v40, %v1106_v13  ;;  %v1233_v35 = vpop.xlane.xlu2 %1232 }
 0x286   : > { %v1285_v0 = vsub.f32 %v2493_v55, %v1233_v35 }
 0x287   : > { %v2599_v16 = vadd.f32 %v1195_v14, %v1107_v23 }
 0x288   : > { %v2601_v17 = vpop.eup %1871  ;;  %v1328_v9 = vmul.f32 1.442695, %v1285_v0 }
 0x289   : > { %1390 = vadd.xlane.f32.xlu0 %v2601_v17  ;;  %1262 = vmax.xlane.f32.xlu2 %v2599_v16 }
 0x28c   : > { %v1108_v41 = vpop.f32.mrf.mxu3  ;;  %v1197_v18 = vpop.f32.mrf.mxu0 }
 0x28d   : > { %v1109_v22 = vadd.f32 %v2423_v40, %v1108_v41  ;;  %v1235_v27 = vpop.xlane.xlu0 %1234 }
 0x28e   : > { %v1286_v34 = vsub.f32 %v2498_v6, %v1235_v27 }
 0x28f   : > { %v2606_v24 = vadd.f32 %v1197_v18, %v1109_v22 }
 0x290   : > { %v1330_v37 = vmul.f32 1.442695, %v1286_v34 }
 0x291   : > { %1264 = vmax.xlane.f32.xlu0 %v2606_v24 }
 0x292   : > { %1873 = vpow2.f32 %v1330_v37 }
 0x294   : > { %v1111_v25 = vpop.f32.mrf.mxu3  ;;  %v1200_v59 = vpop.f32.mrf.mxu0 }
 0x295   : > { %v1112_v26 = vadd.f32 %v2423_v40, %v1111_v25  ;;  %v1237_v44 = vpop.xlane.xlu1 %1236 }
 0x296   : > { %v1287_v6 = vsub.f32 %v2505_v20, %v1237_v44 }
 0x297   : > { %v2610_v32 = vadd.f32 %v1200_v59, %v1112_v26 }
 0x298   : > { %v2620_v54 = vpop.eup %1873  ;;  %v1332_v58 = vmul.f32 1.442695, %v1287_v6 }
 0x299   : > { %1266 = vmax.xlane.f32.xlu1 %v2610_v32 }
 0x29c   : > { %v1113_v1 = vpop.f32.mrf.mxu3  ;;  %v1202_v39 = vpop.f32.mrf.mxu0 }
 0x29d   : > { %v1114_v33 = vadd.f32 %v2423_v40, %v1113_v1  ;;  %v1239_v45 = vpop.xlane.xlu2 %1238 }
 0x29f   : > { %v2615_v42 = vadd.f32 %v1202_v39, %v1114_v33 }
 0x2a1   : > { %1268 = vmax.xlane.f32.xlu2 %v2615_v42 }
 0x2a4   : > { %v1116_v50 = vpop.f32.mrf.mxu3  ;;  %v1241_v48 = vpop.xlane.xlu0 %1240 }
 0x2a5   : > { %v1289_v52 = vsub.f32 %v2515_v36, %v1241_v48  ;;  %v1117_v57 = vadd.f32 %v2423_v40, %v1116_v50 }
 0x2a7   : > { %v1336_v53 = vmul.f32 1.442695, %v1289_v52 }
 0x2a9   : > { %1875 = vpow2.f32 %v1336_v53  ;;  %1394 = vadd.xlane.f32.xlu2 %v2620_v54 }
 0x2aa   : > { %v1205_v60 = vpop.f32.mrf.mxu2 }
 0x2ab   : > { %v2624_v63 = vadd.f32 %v1205_v60, %v1117_v57 }
 0x2ac   : > { %v1371_v3 = vpop.xlane.xlu2 %1370  ;;  %v1243_v36 = vpop.xlane.xlu1 %1242 }
 0x2ad   : > { %1877 = vrcp.f32 %v1371_v3  ;;  %1270 = vmax.xlane.f32.xlu0 %v2624_v63  ;;  %v1118_v20 = vpop.f32.mrf.mxu3  ;;  %v1290_v4 = vsub.f32 %v2520_v46, %v1243_v36 }
 0x2ae   : > { %1879 = vpow2.f32 %v1332_v58  ;;  %v1119_v11 = vadd.f32 %v2423_v40, %v1118_v20  ;;  %v1288_v40 = vsub.f32 %v2510_v31, %v1239_v45 }
 0x2af   : > { %v2630_v7 = vpop.eup %1875  ;;  %v1338_v55 = vmul.f32 1.442695, %v1290_v4  ;;  %1881 = vpow2.f32 %v1328_v9 }
 0x2b0   : > { %v1334_v25 = vmul.f32 1.442695, %v1288_v40 }
 0x2b1   : > { %1400 = vadd.xlane.f32.xlu2 %v2630_v7 }
 0x2b2   : > { %v1207_v13 = vpop.f32.mrf.mxu2 }
 0x2b3   : > { %v1878_v14 = vpop.eup %1877  ;;  %v2636_v23 = vadd.f32 %v1207_v13, %v1119_v11 }
 0x2b4   : > { %v2638_v41 = vpop.eup %1879  ;;  %v1466_v18 = vmul.f32 %v1878_v14, %v2522_v47  ;;  %v1373_v46 = vpop.xlane.xlu0 %1372 }
 0x2b5   : > { %1883 = vrcp.f32 %v1373_v46  ;;  %1272 = vmax.xlane.f32.xlu1 %v2636_v23  ;;  %1396 = vadd.xlane.f32.xlu0 %v2638_v41  ;;  %v2647_v22 = vpop.eup %1881  ;;  %v1245_v26 = vpop.xlane.xlu2 %1244 }
 0x2b6   : > { %1498 = vst [vmem:[%s2644_s16] sm:$0xff] %v1466_v18  ;;  %1885 = vpow2.f32 %v1338_v55  ;;  %v1291_v1 = vsub.f32 %v2528_v49, %v1245_v26 }
 0x2b8   : > { %v1340_v37 = vmul.f32 1.442695, %v1291_v1 }
 0x2bb   : > { %v1884_v59 = vpop.eup %1883 }
 0x2bc   : > { %v2649_v47 = vpop.eup %1885  ;;  %v1467_v27 = vmul.f32 %v1884_v59, %v2530_v61  ;;  %v1375_v34 = vpop.xlane.xlu1 %1374 }
 0x2bd   : > { %v1247_v35 = vpop.xlane.xlu0 %1246  ;;  %1887 = vrcp.f32 %v1375_v34  ;;  %1392 = vadd.xlane.f32.xlu1 %v2647_v22  ;;  %1402 = vadd.xlane.f32.xlu0 %v2649_v47 }
 0x2be   : > { %v1292_v31 = vsub.f32 %v2536_v2, %v1247_v35  ;;  %1889 = vpow2.f32 %v1334_v25  ;;  %1499 = vst [vmem:[%s2644_s16 + $0x8] sm:$0xff] %v1467_v27 }
 0x2c0   : > { %v1342_v33 = vmul.f32 1.442695, %v1292_v31 }
 0x2c2   : > { %1891 = vpow2.f32 %v1342_v33 }
 0x2c3   : > { %v1888_v39 = vpop.eup %1887 }
 0x2c4   : > { %v2657_v44 = vpop.eup %1889  ;;  %v1468_v61 = vmul.f32 %v1888_v39, %v2538_v8  ;;  %v1377_v45 = vpop.xlane.xlu2 %1376 }
 0x2c5   : > { %v1249_v50 = vpop.xlane.xlu1 %1248  ;;  %1893 = vrcp.f32 %v1377_v45  ;;  %1398 = vadd.xlane.f32.xlu1 %v2657_v44 }
 0x2c6   : > { %v1293_v2 = vsub.f32 %v2544_v12, %v1249_v50  ;;  %1895 = vpow2.f32 %v1340_v37  ;;  %1500 = vst [vmem:[%s2644_s16 + $0x10] sm:$0xff] %v1468_v61 }
 0x2c8   : > { %v2663_v48 = vpop.eup %1891  ;;  %v1344_v49 = vmul.f32 1.442695, %v1293_v2 }
 0x2c9   : > { %1406 = vadd.xlane.f32.xlu2 %v2663_v48 }
 0x2ca   : > { %1897 = vpow2.f32 %v1344_v49 }
 0x2cb   : > { %v1894_v52 = vpop.eup %1893 }
 0x2cc   : > { %v2666_v6 = vpop.eup %1895  ;;  %v1469_v8 = vmul.f32 %v1894_v52, %v2546_v19  ;;  %v1379_v53 = vpop.xlane.xlu0 %1378 }
 0x2cd   : > { %v1251_v57 = vpop.xlane.xlu2 %1250  ;;  %1899 = vrcp.f32 %v1379_v53  ;;  %1404 = vadd.xlane.f32.xlu1 %v2666_v6 }
 0x2ce   : > { %v1294_v12 = vsub.f32 %v2552_v21, %v1251_v57  ;;  %1501 = vst [vmem:[%s2644_s16 + $0x18] sm:$0xff] %v1469_v8 }
 0x2d0   : > { %v2672_v58 = vpop.eup %1897  ;;  %v1346_v60 = vmul.f32 1.442695, %v1294_v12 }
 0x2d1   : > { %1408 = vadd.xlane.f32.xlu0 %v2672_v58 }
 0x2d2   : > { %1901 = vpow2.f32 %v1346_v60 }
 0x2d3   : > { %v1900_v0 = vpop.eup %1899 }
 0x2d4   : > { %v1470_v3 = vmul.f32 %v1900_v0, %v2554_v30  ;;  %v1381_v19 = vpop.xlane.xlu1 %1380  ;;  %v1253_v36 = vpop.xlane.xlu0 %1252 }
 0x2d5   : > { %1903 = vrcp.f32 %v1381_v19  ;;  %v1295_v20 = vsub.f32 %v2560_v28, %v1253_v36 }
 0x2d6   : > { %1502 = vst [vmem:[%s2644_s16 + $0x20] sm:$0xff] %v1470_v3 }
 0x2d7   : > { %v1348_v4 = vmul.f32 1.442695, %v1295_v20 }
 0x2d8   : > { %v2678_v21 = vpop.eup %1901 }
 0x2d9   : > { %1410 = vadd.xlane.f32.xlu1 %v2678_v21  ;;  %1905 = vpow2.f32 %v1348_v4 }
 0x2db   : > { %v1904_v9 = vpop.eup %1903 }
 0x2dc   : > { %v1471_v11 = vmul.f32 %v1904_v9, %v2562_v43  ;;  %v1383_v55 = vpop.xlane.xlu2 %1382  ;;  %v1255_v13 = vpop.xlane.xlu1 %1254 }
 0x2dd   : > { %1907 = vrcp.f32 %v1383_v55  ;;  %v1296_v30 = vsub.f32 %v2568_v38, %v1255_v13 }
 0x2de   : > { %1503 = vst [vmem:[%s2644_s16 + $0x28] sm:$0xff] %v1471_v11 }
 0x2df   : > { %v2684_v14 = vpop.eup %1905  ;;  %v1350_v28 = vmul.f32 1.442695, %v1296_v30 }
 0x2e0   : > { %1412 = vadd.xlane.f32.xlu2 %v2684_v14 }
 0x2e1   : > { %1909 = vpow2.f32 %v1350_v28 }
 0x2e3   : > { %v1908_v18 = vpop.eup %1907 }
 0x2e4   : > { %v1472_v46 = vmul.f32 %v1908_v18, %v2570_v56  ;;  %v1385_v40 = vpop.xlane.xlu0 %1384  ;;  %v1257_v25 = vpop.xlane.xlu2 %1256 }
 0x2e5   : > { %1911 = vrcp.f32 %v1385_v40  ;;  %v1297_v43 = vsub.f32 %v2576_v51, %v1257_v25 }
 0x2e6   : > { %1504 = vst [vmem:[%s2644_s16 + $0x30] sm:$0xff] %v1472_v46 }
 0x2e7   : > { %v2690_v59 = vpop.eup %1909  ;;  %v1352_v38 = vmul.f32 1.442695, %v1297_v43 }
 0x2e8   : > { %1414 = vadd.xlane.f32.xlu0 %v2690_v59 }
 0x2e9   : > { %1913 = vpow2.f32 %v1352_v38 }
 0x2eb   : > { %v1912_v26 = vpop.eup %1911 }
 0x2ec   : > { %v1473_v27 = vmul.f32 %v1912_v26, %v2578_v5  ;;  %v1387_v34 = vpop.xlane.xlu1 %1386  ;;  %v1259_v35 = vpop.xlane.xlu0 %1258 }
 0x2ed   : > { %1915 = vrcp.f32 %v1387_v34  ;;  %v1298_v56 = vsub.f32 %v2584_v62, %v1259_v35 }
 0x2ee   : > { %1505 = vst [vmem:[%s2644_s16 + $0x38] sm:$0xff] %v1473_v27 }
 0x2ef   : > { %v2696_v31 = vpop.eup %1913  ;;  %v1354_v51 = vmul.f32 1.442695, %v1298_v56 }
 0x2f0   : > { %1416 = vadd.xlane.f32.xlu1 %v2696_v31 }
 0x2f1   : > { %1917 = vpow2.f32 %v1354_v51 }
 0x2f3   : > { %v1916_v1 = vpop.eup %1915 }
 0x2f4   : > { %v1474_v33 = vmul.f32 %v1916_v1, %v2586_v15  ;;  %v1389_v37 = vpop.xlane.xlu2 %1388  ;;  %v1261_v39 = vpop.xlane.xlu1 %1260 }
 0x2f5   : > { %1919 = vrcp.f32 %v1389_v37  ;;  %v1299_v5 = vsub.f32 %v2592_v10, %v1261_v39 }
 0x2f6   : > { %1506 = vst [vmem:[%s2644_s16 + $0x40] sm:$0xff] %v1474_v33 }
 0x2f7   : > { %v2702_v61 = vpop.eup %1917  ;;  %v1356_v62 = vmul.f32 1.442695, %v1299_v5 }
 0x2f8   : > { %1418 = vadd.xlane.f32.xlu2 %v2702_v61 }
 0x2f9   : > { %1921 = vpow2.f32 %v1356_v62 }
 0x2fb   : > { %v1920_v45 = vpop.eup %1919 }
 0x2fc   : > { %v1475_v50 = vmul.f32 %v1920_v45, %v2594_v29  ;;  %v1391_v2 = vpop.xlane.xlu0 %1390  ;;  %v1263_v49 = vpop.xlane.xlu2 %1262 }
 0x2fd   : > { %1923 = vrcp.f32 %v1391_v2  ;;  %v1300_v15 = vsub.f32 %v2599_v16, %v1263_v49 }
 0x2fe   : > { %1507 = vst [vmem:[%s2644_s16 + $0x48] sm:$0xff] %v1475_v50 }
 0x2ff   : > { %v2708_v52 = vpop.eup %1921  ;;  %v1358_v10 = vmul.f32 1.442695, %v1300_v15 }
 0x300   : > { %1420 = vadd.xlane.f32.xlu0 %v2708_v52 }
 0x301   : > { %1925 = vpow2.f32 %v1358_v10 }
 0x303   : > { %v1924_v8 = vpop.eup %1923 }
 0x304   : > { %v1476_v53 = vmul.f32 %v1924_v8, %v2601_v17  ;;  %v1265_v57 = vpop.xlane.xlu0 %1264 }
 0x305   : > { %v1301_v12 = vsub.f32 %v2606_v24, %v1265_v57 }
 0x306   : > { %1508 = vst [vmem:[%s2644_s16 + $0x50] sm:$0xff] %v1476_v53 }
 0x307   : > { %v2714_v29 = vpop.eup %1925  ;;  %v1360_v60 = vmul.f32 1.442695, %v1301_v12 }
 0x308   : > { %1422 = vadd.xlane.f32.xlu1 %v2714_v29 }
 0x309   : > { %1927 = vpow2.f32 %v1360_v60 }
 0x30c   : > { %v1267_v16 = vpop.xlane.xlu1 %1266 }
 0x30d   : > { %v1302_v0 = vsub.f32 %v2610_v32, %v1267_v16 }
 0x30f   : > { %v2718_v3 = vpop.eup %1927  ;;  %v1362_v19 = vmul.f32 1.442695, %v1302_v0 }
 0x310   : > { %1424 = vadd.xlane.f32.xlu2 %v2718_v3 }
 0x311   : > { %1929 = vpow2.f32 %v1362_v19 }
 0x314   : > { %v1269_v17 = vpop.xlane.xlu2 %1268 }
 0x315   : > { %v1303_v36 = vsub.f32 %v2615_v42, %v1269_v17 }
 0x317   : > { %v2722_v24 = vpop.eup %1929  ;;  %v1364_v20 = vmul.f32 1.442695, %v1303_v36 }
 0x318   : > { %1426 = vadd.xlane.f32.xlu0 %v2722_v24 }
 0x319   : > { %1931 = vpow2.f32 %v1364_v20 }
 0x31c   : > { %v1395_v4 = vpop.xlane.xlu2 %1394 }
 0x31d   : > { %1933 = vrcp.f32 %v1395_v4 }
 0x31f   : > { %v2725_v9 = vpop.eup %1931 }
 0x320   : > { %1428 = vadd.xlane.f32.xlu1 %v2725_v9  ;;  %v1271_v32 = vpop.xlane.xlu0 %1270 }
 0x321   : > { %v1304_v11 = vsub.f32 %v2624_v63, %v1271_v32 }
 0x323   : > { %v1934_v55 = vpop.eup %1933  ;;  %v1366_v13 = vmul.f32 1.442695, %v1304_v11 }
 0x324   : > { %v1478_v42 = vmul.f32 %v1934_v55, %v2620_v54  ;;  %v1401_v30 = vpop.xlane.xlu2 %1400 }
 0x325   : > { %1935 = vpow2.f32 %v1366_v13 }
 0x326   : > { %1510 = vst [vmem:[%s2644_s16 + $0x60] sm:$0xff] %v1478_v42  ;;  %1937 = vrcp.f32 %v1401_v30 }
 0x328   : > { %v1273_v28 = vpop.xlane.xlu1 %1272  ;;  %v1397_v18 = vpop.xlane.xlu0 %1396 }
 0x329   : > { %v1305_v46 = vsub.f32 %v2636_v23, %v1273_v28  ;;  %1939 = vrcp.f32 %v1397_v18 }
 0x32b   : > { %v2732_v40 = vpop.eup %1935  ;;  %v1368_v25 = vmul.f32 1.442695, %v1305_v46 }
 0x32c   : > { %v1938_v43 = vpop.eup %1937  ;;  %1430 = vadd.xlane.f32.xlu2 %v2732_v40 }
 0x32d   : > { %v1481_v63 = vmul.f32 %v1938_v43, %v2630_v7  ;;  %1941 = vpow2.f32 %v1368_v25 }
 0x32f   : > { %v1940_v54 = vpop.eup %1939  ;;  %1513 = vst [vmem:[%s2644_s16 + $0x78] sm:$0xff] %v1481_v63 }
 0x330   : > { %v1479_v38 = vmul.f32 %v1940_v54, %v2638_v41  ;;  %v1393_v26 = vpop.xlane.xlu1 %1392  ;;  %v1403_v27 = vpop.xlane.xlu0 %1402 }
 0x331   : > { %1943 = vrcp.f32 %v1393_v26 }
 0x332   : > { %1511 = vst [vmem:[%s2644_s16 + $0x68] sm:$0xff] %v1479_v38  ;;  %1945 = vrcp.f32 %v1403_v27 }
 0x333   : > { %v2739_v23 = vpop.eup %1941 }
 0x334   : > { %1432 = vadd.xlane.f32.xlu0 %v2739_v23 }
 0x337   : > { %v1944_v34 = vpop.eup %1943 }
 0x338   : > { %v1946_v35 = vpop.eup %1945  ;;  %v1477_v7 = vmul.f32 %v1944_v34, %v2647_v22  ;;  %v1399_v56 = vpop.xlane.xlu1 %1398 }
 0x339   : > { %v1482_v51 = vmul.f32 %v1946_v35, %v2649_v47  ;;  %1947 = vrcp.f32 %v1399_v56 }
 0x33a   : > { %1509 = vst [vmem:[%s2644_s16 + $0x58] sm:$0xff] %v1477_v7 }
 0x33b   : > { %1514 = vst [vmem:[%s2644_s16 + $0x80] sm:$0xff] %v1482_v51 }
 0x33c   : > { %v1407_v41 = vpop.xlane.xlu2 %1406 }
 0x33d   : > { %1949 = vrcp.f32 %v1407_v41 }
 0x33f   : > { %v1948_v1 = vpop.eup %1947 }
 0x340   : > { %v1480_v33 = vmul.f32 %v1948_v1, %v2657_v44  ;;  %v1405_v37 = vpop.xlane.xlu1 %1404 }
 0x341   : > { %1951 = vrcp.f32 %v1405_v37 }
 0x342   : > { %1512 = vst [vmem:[%s2644_s16 + $0x70] sm:$0xff] %v1480_v33 }
 0x343   : > { %v1950_v39 = vpop.eup %1949 }
 0x344   : > { %v1484_v22 = vmul.f32 %v1950_v39, %v2663_v48  ;;  %v1409_v5 = vpop.xlane.xlu0 %1408 }
 0x345   : > { %1953 = vrcp.f32 %v1409_v5 }
 0x346   : > { %1516 = vst [vmem:[%s2644_s16 + $0x90] sm:$0xff] %v1484_v22 }
 0x347   : > { %v1952_v47 = vpop.eup %1951 }
 0x348   : > { %v1483_v62 = vmul.f32 %v1952_v47, %v2666_v6 }
 0x34a   : > { %1515 = vst [vmem:[%s2644_s16 + $0x88] sm:$0xff] %v1483_v62 }
 0x34b   : > { %v1954_v45 = vpop.eup %1953 }
 0x34c   : > { %v1485_v50 = vmul.f32 %v1954_v45, %v2672_v58  ;;  %v1411_v44 = vpop.xlane.xlu1 %1410 }
 0x34d   : > { %1955 = vrcp.f32 %v1411_v44 }
 0x34e   : > { %1517 = vst [vmem:[%s2644_s16 + $0x98] sm:$0xff] %v1485_v50 }
 0x353   : > { %v1956_v2 = vpop.eup %1955  ;;  %v1413_v48 = vpop.xlane.xlu2 %1412 }
 0x354   : > { %v1486_v49 = vmul.f32 %v1956_v2, %v2678_v21  ;;  %1957 = vrcp.f32 %v1413_v48 }
 0x356   : > { %1518 = vst [vmem:[%s2644_s16 + $0xa0] sm:$0xff] %v1486_v49 }
 0x35a   : > { %v1958_v15 = vpop.eup %1957 }
 0x35b   : > { %v1487_v10 = vmul.f32 %v1958_v15, %v2684_v14  ;;  %v1415_v6 = vpop.xlane.xlu0 %1414 }
 0x35c   : > { %1959 = vrcp.f32 %v1415_v6 }
 0x35d   : > { %1519 = vst [vmem:[%s2644_s16 + $0xa8] sm:$0xff] %v1487_v10 }
 0x362   : > { %v1960_v8 = vpop.eup %1959 }
 0x363   : > { %v1488_v58 = vmul.f32 %v1960_v8, %v2690_v59  ;;  %v1417_v53 = vpop.xlane.xlu1 %1416 }
 0x364   : > { %1961 = vrcp.f32 %v1417_v53 }
 0x365   : > { %1520 = vst [vmem:[%s2644_s16 + $0xb0] sm:$0xff] %v1488_v58 }
 0x36a   : > { %v1962_v57 = vpop.eup %1961 }
 0x36b   : > { %v1489_v21 = vmul.f32 %v1962_v57, %v2696_v31  ;;  %v1419_v12 = vpop.xlane.xlu2 %1418 }
 0x36c   : > { %1963 = vrcp.f32 %v1419_v12 }
 0x36d   : > { %1521 = vst [vmem:[%s2644_s16 + $0xb8] sm:$0xff] %v1489_v21 }
 0x372   : > { %v1964_v60 = vpop.eup %1963 }
 0x373   : > { %v1490_v14 = vmul.f32 %v1964_v60, %v2702_v61  ;;  %v1421_v16 = vpop.xlane.xlu0 %1420 }
 0x374   : > { %1965 = vrcp.f32 %v1421_v16 }
 0x375   : > { %1522 = vst [vmem:[%s2644_s16 + $0xc0] sm:$0xff] %v1490_v14 }
 0x37a   : > { %v1966_v0 = vpop.eup %1965 }
 0x37b   : > { %v1491_v59 = vmul.f32 %v1966_v0, %v2708_v52  ;;  %v1423_v19 = vpop.xlane.xlu1 %1422 }
 0x37c   : > { %1967 = vrcp.f32 %v1423_v19 }
 0x37d   : > { %1523 = vst [vmem:[%s2644_s16 + $0xc8] sm:$0xff] %v1491_v59 }
 0x382   : > { %v1968_v17 = vpop.eup %1967 }
 0x383   : > { %v1492_v31 = vmul.f32 %v1968_v17, %v2714_v29  ;;  %v1425_v36 = vpop.xlane.xlu2 %1424 }
 0x384   : > { %1969 = vrcp.f32 %v1425_v36 }
 0x385   : > { %1524 = vst [vmem:[%s2644_s16 + $0xd0] sm:$0xff] %v1492_v31 }
 0x38a   : > { %v1970_v61 = vpop.eup %1969 }
 0x38b   : > { %v1493_v20 = vmul.f32 %v1970_v61, %v2718_v3  ;;  %v1427_v4 = vpop.xlane.xlu0 %1426 }
 0x38c   : > { %1971 = vrcp.f32 %v1427_v4 }
 0x38d   : > { %1525 = vst [vmem:[%s2644_s16 + $0xd8] sm:$0xff] %v1493_v20 }
 0x392   : > { %v1972_v32 = vpop.eup %1971 }
 0x393   : > { %v1494_v52 = vmul.f32 %v1972_v32, %v2722_v24  ;;  %v1429_v11 = vpop.xlane.xlu1 %1428 }
 0x394   : > { %1973 = vrcp.f32 %v1429_v11 }
 0x395   : > { %1526 = vst [vmem:[%s2644_s16 + $0xe0] sm:$0xff] %v1494_v52 }
 0x39a   : > { %v1974_v29 = vpop.eup %1973 }
 0x39b   : > { %v1495_v55 = vmul.f32 %v1974_v29, %v2725_v9 }
 0x39d   : > { %1527 = vst [vmem:[%s2644_s16 + $0xe8] sm:$0xff] %v1495_v55 }
 0x39f   : > { %v1431_v13 = vpop.xlane.xlu2 %1430 }
 0x3a0   : > { %1975 = vrcp.f32 %v1431_v13 }
 0x3a6   : > { %v1976_v3 = vpop.eup %1975 }
 0x3a7   : > { %v1496_v42 = vmul.f32 %v1976_v3, %v2732_v40  ;;  %v1433_v30 = vpop.xlane.xlu0 %1432 }
 0x3a8   : > { %1977 = vrcp.f32 %v1433_v30 }
 0x3a9   : > { %1528 = vst [vmem:[%s2644_s16 + $0xf0] sm:$0xff] %v1496_v42 }
 0x3ae   : > { %v1978_v24 = vpop.eup %1977 }
 0x3af   : > { %v1497_v9 = vmul.f32 %v1978_v24, %v2739_v23 }
 0x3b1   : > { %1529 = vst [vmem:[%s2644_s16 + $0xf8] sm:$0xff] %v1497_v9 }
 0x3b2   : > { %2006 = shalt.err (!%p2003_p3)
}
 0x3b3   : > { %s2043_s14 = smov 128   ;;  %s2044_s16 = smov 8  }
 0x3b4   : > { %1808 = dma.vmem_to_hbm [thread:$0]  (%p2123_p5), %s1544_s22, 4096, %s1546_s23, %s1531_s28, %s2043_s14, %s2043_s14, %s2044_s16  }
 0x3b5 PF: > { %p1814_p4 = scmp.ge.s32.totalorder %s2041_s27, 2  ;;  %s1560_s18 = sand.u32 1, %s2029_s24  }
 0x3b6   : > { %s1561_s20 = scalar_lea.sflag [#allocation3], %s1560_s18 }
 0x3b7   : > { %p1811_p7 = pnand %p1814_p4, %p2127_p6 }
 0x3b9   : > { %p1812_p8 = pneg %p1811_p7 }
 0x3bb   : > { %2024 = dma.done.wait (%p1812_p8), %s1561_s20, 4096  }
 0x3bc   : > { %2026 = vsyncadd (%p1812_p8), %s1561_s20, 4294963200  ;;  %p17_p9 = scmp.ge.s32.totalorder %s2110_s30, 4   ;;  %s2822_s24 = smov %s2033_s25 }
 0x3bd   : > { %s2823_s25 = smov %s2037_s26  ;;  %s2824_s26 = smov %s2121_s10 }
 0x3be   : > { %s2825_s27 = smov %s2110_s30  ;;  %19 = sbr.rel (!%p17_p9) target bundleno = 3 (0x3), region = 83 }
 0x3c3   :  { %1567 = vsyncpa [#allocation3], 1 }
 0x3c4   :  { %1569 = vsyncpa [#allocation3 + $0x1], 1 }

</bundles_post_ra>
